<compile_context>
chip_gen: v5e
topology: v5e:2x2
jax: 0.10.0
libtpu: 0.0.40
codegen_flags: <defaults>
</compile_context>

<pallas_src>
import math
from functools import partial

import jax
import jax.numpy as jnp
from jax import lax
from jax.experimental import pallas as pl
from jax.experimental.pallas import tpu as pltpu

BN_EPS = 1e-5


# ----------------------------- Pallas kernels ------------------------------
def _conv_mm_kernel(w_ref, p_ref, b_ref, o_ref, *, relu):
    acc = jnp.dot(w_ref[...], p_ref[...], preferred_element_type=jnp.float32)
    acc = acc + b_ref[...]                       # bias/BN-shift folded: one (O,1) FMA-ish add
    if relu:
        acc = jnp.maximum(acc, 0.0)
    o_ref[...] = acc


def _conv_mm_res_relu_kernel(w_ref, p_ref, b_ref, r_ref, o_ref):
    acc = jnp.dot(w_ref[...], p_ref[...], preferred_element_type=jnp.float32)
    o_ref[...] = jnp.maximum(acc + b_ref[...] + r_ref[...], 0.0)


def _pick_tm(M):
    """Largest lane-dense tile that yields >=2 grid steps (v7x dual-TC); else whole M."""
    for t in (256, 128):
        if M % t == 0 and M // t >= 2:
            return t
    return M


def conv_matmul(wmat, patches, bias, residual=None, relu=False):
    """(O,K) @ (K,M) + bias[:,None]  [+ residual]  [-> relu], output (O, M) lane-dense."""
    O, K = wmat.shape
    M = patches.shape[1]
    tm = _pick_tm(M)
    in_specs = [
        pl.BlockSpec((O, K), lambda i: (0, 0)),
        pl.BlockSpec((K, tm), lambda i: (0, i)),
        pl.BlockSpec((O, 1), lambda i: (0, 0)),
    ]
    args = [wmat, patches, bias.reshape(O, 1)]
    if residual is not None:
        in_specs.append(pl.BlockSpec((O, tm), lambda i: (0, i)))
        args.append(residual)
        kernel = _conv_mm_res_relu_kernel
    else:
        kernel = partial(_conv_mm_kernel, relu=relu)
    return pl.pallas_call(
        kernel,
        out_shape=jax.ShapeDtypeStruct((O, M), jnp.float32),
        grid=(M // tm,),
        in_specs=in_specs,
        out_specs=pl.BlockSpec((O, tm), lambda i: (0, i)),
        compiler_params=pltpu.CompilerParams(
            dimension_semantics=("parallel",)),
    )(*args)


# --------------------- Conv2d via strided-slice patches ---------------------
def _build_patches(x, kh, kw, sh, sw, ph, pw, dh, dw):
    """x: (C, N, H, W) -> patches (KH*KW*C, N*OH*OW) built from strided slices."""
    C, N, H, W = x.shape
    xp = jnp.pad(x, ((0, 0), (0, 0), (ph, ph), (pw, pw))) if (ph or pw) else x
    Hp, Wp = H + 2 * ph, W + 2 * pw
    oh = (Hp - (dh * (kh - 1) + 1)) // sh + 1
    ow = (Wp - (dw * (kw - 1) + 1)) // sw + 1
    taps = []
    for i in range(kh):
        for j in range(kw):
            sl = lax.slice(
                xp,
                (0, 0, i * dh, j * dw),
                (C, N, i * dh + (oh - 1) * sh + 1, j * dw + (ow - 1) * sw + 1),
                (1, 1, sh, sw))                       # (C, N, oh, ow)
            taps.append(sl.reshape(C, N * oh * ow))
    return jnp.concatenate(taps, axis=0), oh, ow      # rows: (kh, kw) tap-major, then channel


def conv2d_cf(x, w, b, stride, padding, dilation, residual=None, relu=False):
    """PyTorch-semantics Conv2d on channels-first-flattened activations.
    x: (C, N, H, W), w: (O, C, KH, KW), b: (O,) -> (O, N, OH, OW)."""
    O, C, KH, KW = w.shape
    patches, oh, ow = _build_patches(x, KH, KW, stride[0], stride[1],
                                     padding[0], padding[1],
                                     dilation[0], dilation[1])
    wmat = jnp.transpose(w, (0, 2, 3, 1)).reshape(O, KH * KW * C)   # columns match tap order
    res2 = None if residual is None else residual.reshape(residual.shape[0], -1)
    out = conv_matmul(wmat, patches, b, residual=res2, relu=relu)
    N = x.shape[1]
    return out.reshape(O, N, oh, ow)


# ------------------------------ Module blocks -------------------------------
def _fold_bn(bn):
    scale = bn['gamma'] / jnp.sqrt(bn['var'] + BN_EPS)
    shift = bn['beta'] - bn['mean'] * scale
    return scale, shift


def conv_layer_2d(x, p, stride, padding, dilation):
    """ConvLayer2D: BatchNorm2d(eval) -> ReLU -> Conv2d, on (C,N,H,W) activations.
    BN+ReLU is a single fused pointwise op (no pallas launch, fused by XLA with the pad).
    # TODO(synk): Dropout2d(0.2) in the original ConvLayer2D is identity at eval; omitted.
    """
    scale, shift = _fold_bn(p['bn'])
    y = jnp.maximum(x * scale[:, None, None, None] + shift[:, None, None, None], 0.0)
    return conv2d_cf(y, p['w'], p['b'], stride, padding, dilation)


def residual_block(x, p):
    """ResidualBlock: conv1 -> bn1 -> relu -> conv2 -> bn2 -> (+x) -> relu.
    BN scales are folded into the conv weights; relu / residual-add+relu are matmul epilogues."""
    s1, t1 = _fold_bn(p['bn1'])
    w1 = p['w1'] * s1[:, None, None, None]
    b1 = p['b1'] * s1 + t1
    h = conv2d_cf(x, w1, b1, (1, 1), (1, 1), (1, 1), relu=True)

    s2, t2 = _fold_bn(p['bn2'])
    w2 = p['w2'] * s2[:, None, None, None]
    b2 = p['b2'] * s2 + t2
    return conv2d_cf(h, w2, b2, (1, 1), (1, 1), (1, 1), residual=x, relu=True)


def features_extractor(x, params, cfg):
    out = jnp.transpose(x, (1, 0, 2, 3))                 # NCHW -> (C,N,H,W), once
    # TemporalBlock: parallel dilated temporal convs, concat on channel axis.
    feats = [conv_layer_2d(out, lp, cfg['temporal_stride'],
                           cfg['temporal_padding'][i],
                           cfg['temporal_dilation_list'][i])
             for i, lp in enumerate(params['temporal'])]
    out = jnp.concatenate(feats, axis=0)
    # SpatialBlock: parallel spatial convs, concat on channel axis.
    feats = [conv_layer_2d(out, lp, cfg['spatial_stride'],
                           cfg['spatial_padding'][i], (1, 1))
             for i, lp in enumerate(params['spatial'])]
    out = jnp.concatenate(feats, axis=0)
    # Residual blocks (ResidualBlock + downsampling ConvLayer2D).
    for rb in params['res_blocks']:
        out = residual_block(out, rb['res'])
        out = conv_layer_2d(out, rb['down'],
                            (cfg['down_stride'], cfg['down_stride']),
                            (0, 0), (1, 1))
    # Final conv.
    out = conv_layer_2d(out, params['final'], (1, 1), (0, 0), (1, 1))
    return jnp.transpose(out, (1, 0, 2, 3))              # (C,N,H,W) -> NCHW, once


# --------------------------- Config / parameters ----------------------------
def make_config():
    cfg = dict(
        in_channels=1, temp_channels=4, out_channels=8,
        input_width=32, in_height=16,
        temporal_kernel=(1, 5), temporal_stride=(1, 2),
        temporal_dilation_list=[(1, 1), (1, 2)],
        num_temporal_layers=2,
        num_spatial_layers=2, spatial_stride=(2, 1),
        num_residual_blocks=1, down_kernel=3, down_stride=2,
    )
    # TemporalBlock padding arithmetic (mirrors the PyTorch code).
    tpad = []
    for dil in cfg['temporal_dilation_list']:
        fs = cfg['temporal_kernel'][1] * dil[1] - 1
        tp = math.floor((fs - 1) / 2) - 1 * (dil[1] // 2 - 1)
        tpad.append((0, tp))
    cfg['temporal_padding'] = tpad
    # SpatialBlock kernels / padding arithmetic.
    sk = [((cfg['in_height'] // (i + 1)), 1) for i in range(cfg['num_spatial_layers'])]
    sp = [(math.floor((k[0] - 1) / 2), 0) for k in sk]
    cfg['spatial_kernels'] = sk
    cfg['spatial_padding'] = sp
    return cfg


def _init_bn(key, c):
    k1, k2, k3, k4 = jax.random.split(key, 4)
    return dict(gamma=1.0 + 0.1 * jax.random.normal(k1, (c,), jnp.float32),
                beta=0.1 * jax.random.normal(k2, (c,), jnp.float32),
                mean=0.1 * jax.random.normal(k3, (c,), jnp.float32),
                var=0.5 + jax.random.uniform(k4, (c,), jnp.float32))


def _init_conv(key, o, c, kh, kw):
    k1, k2 = jax.random.split(key)
    w = 0.1 * jax.random.normal(k1, (o, c, kh, kw), jnp.float32)
    b = 0.1 * jax.random.normal(k2, (o,), jnp.float32)
    return w, b


def make_params(key, cfg):
    keys = iter(jax.random.split(key, 64))
    params = {}
    temporal = []
    for _ in range(cfg['num_temporal_layers']):
        w, b = _init_conv(next(keys), cfg['temp_channels'], cfg['in_channels'],
                          cfg['temporal_kernel'][0], cfg['temporal_kernel'][1])
        temporal.append(dict(bn=_init_bn(next(keys), cfg['in_channels']), w=w, b=b))
    params['temporal'] = temporal

    sc_in = cfg['temp_channels'] * cfg['num_temporal_layers']
    spatial = []
    for i in range(cfg['num_spatial_layers']):
        kh, kw = cfg['spatial_kernels'][i]
        w, b = _init_conv(next(keys), cfg['out_channels'], sc_in, kh, kw)
        spatial.append(dict(bn=_init_bn(next(keys), sc_in), w=w, b=b))
    params['spatial'] = spatial

    rc = cfg['out_channels'] * cfg['num_spatial_layers']
    res_blocks = []
    for _ in range(cfg['num_residual_blocks']):
        w1, b1 = _init_conv(next(keys), rc, rc, 3, 3)
        w2, b2 = _init_conv(next(keys), rc, rc, 3, 3)
        res = dict(w1=w1, b1=b1, bn1=_init_bn(next(keys), rc),
                   w2=w2, b2=b2, bn2=_init_bn(next(keys), rc))
        dw, db = _init_conv(next(keys), rc, rc, cfg['down_kernel'], cfg['down_kernel'])
        down = dict(bn=_init_bn(next(keys), rc), w=dw, b=db)
        res_blocks.append(dict(res=res, down=down))
    params['res_blocks'] = res_blocks

    fw, fb = _init_conv(next(keys), cfg['out_channels'], rc,
                        cfg['down_kernel'], cfg['down_kernel'])
    params['final'] = dict(bn=_init_bn(next(keys), rc), w=fw, b=fb)
    return params


# ------------------------------ Pure-JAX reference ---------------------------
def _conv2d_ref(x, w, b, stride, padding, dilation):
    out = jax.lax.conv_general_dilated(
        x, w, window_strides=stride,
        padding=[(padding[0], padding[0]), (padding[1], padding[1])],
        rhs_dilation=dilation,
        dimension_numbers=('NCHW', 'OIHW', 'NCHW'))
    return out + b.reshape(1, -1, 1, 1)


def _conv_layer_2d_ref(x, p, stride, padding, dilation):
    s, t = _fold_bn(p['bn'])
    y = jnp.maximum(x * s.reshape(1, -1, 1, 1) + t.reshape(1, -1, 1, 1), 0.0)
    return _conv2d_ref(y, p['w'], p['b'], stride, padding, dilation)


def _residual_block_ref(x, p):
    h = _conv2d_ref(x, p['w1'], p['b1'], (1, 1), (1, 1), (1, 1))
    s1, t1 = _fold_bn(p['bn1'])
    h = jnp.maximum(h * s1.reshape(1, -1, 1, 1) + t1.reshape(1, -1, 1, 1), 0.0)
    h = _conv2d_ref(h, p['w2'], p['b2'], (1, 1), (1, 1), (1, 1))
    s2, t2 = _fold_bn(p['bn2'])
    h = h * s2.reshape(1, -1, 1, 1) + t2.reshape(1, -1, 1, 1)
    return jnp.maximum(h + x, 0.0)


def features_extractor_ref(x, params, cfg):
    feats = [_conv_layer_2d_ref(x, lp, cfg['temporal_stride'],
                                cfg['temporal_padding'][i],
                                cfg['temporal_dilation_list'][i])
             for i, lp in enumerate(params['temporal'])]
    out = jnp.concatenate(feats, axis=1)
    feats = [_conv_layer_2d_ref(out, lp, cfg['spatial_stride'],
                                cfg['spatial_padding'][i], (1, 1))
             for i, lp in enumerate(params['spatial'])]
    out = jnp.concatenate(feats, axis=1)
    for rb in params['res_blocks']:
        out = _residual_block_ref(out, rb['res'])
        out = _conv_layer_2d_ref(out, rb['down'],
                                 (cfg['down_stride'], cfg['down_stride']),
                                 (0, 0), (1, 1))
    out = _conv_layer_2d_ref(out, params['final'], (1, 1), (0, 0), (1, 1))
    return out


# ----------------------------------- Main ------------------------------------
if __name__ == "__main__":
    cfg = make_config()
    key = jax.random.PRNGKey(0)
    kp, kx = jax.random.split(key)
    params = make_params(kp, cfg)
    x = jax.random.normal(
        kx, (2, cfg['in_channels'], cfg['in_height'], cfg['input_width']), jnp.float32)

    fwd = jax.jit(partial(features_extractor, cfg=cfg))
    out = jax.block_until_ready(fwd(x, params))

    ref = features_extractor_ref(x, params, cfg)
    assert out.shape == ref.shape, (out.shape, ref.shape)
    assert jnp.allclose(out, ref, rtol=5e-2, atol=5e-2), \
        float(jnp.max(jnp.abs(out - ref)))
    print("KERNEL_OK")
</pallas_src>

<mosaic_0001>
module attributes {stable_mosaic.version = 11 : i64} {
  func.func @_conv_mm_kernel(%arg0: i32, %arg1: memref<4x5xf32, #tpu.memory_space<vmem>>, %arg2: memref<5x256xf32, #tpu.memory_space<vmem>>, %arg3: memref<4x1xf32, #tpu.memory_space<vmem>>, %arg4: memref<4x256xf32, #tpu.memory_space<vmem>>) attributes {dimension_semantics = [#tpu.dimension_semantics<parallel>], iteration_bounds = array<i64: 2>, scalar_prefetch = 0 : i64, scratch_operands = 0 : i64, tpu.core_type = #tpu.core_type<tc>, window_params = [{pipeline_mode = #tpu.pipeline_mode<synchronous>, transform_indices = @transform_0, window_bounds = array<i64: 4, 5>}, {transform_indices = @transform_1, window_bounds = array<i64: 5, 256>}, {pipeline_mode = #tpu.pipeline_mode<synchronous>, transform_indices = @transform_2, window_bounds = array<i64: 4, 1>}, {transform_indices = @transform_3, window_bounds = array<i64: 4, 256>}]} {
    %c0 = arith.constant 0 : index
    %c0_0 = arith.constant 0 : index
    %0 = vector.load %arg1[%c0, %c0_0] : memref<4x5xf32, #tpu.memory_space<vmem>>, vector<4x5xf32>
    %c0_1 = arith.constant 0 : index
    %c0_2 = arith.constant 0 : index
    %1 = vector.load %arg2[%c0_1, %c0_2] : memref<5x256xf32, #tpu.memory_space<vmem>>, vector<5x256xf32>
    %cst = arith.constant dense<0.000000e+00> : vector<4x256xf32>
    %2 = tpu.matmul %0, %1, %cst {dimension_numbers = #tpu.dot_dimension_numbers<[1], [0], [0], [1], [0, 0, 1, 1], [], []>} : vector<4x5xf32>, vector<5x256xf32>, vector<4x256xf32> -> vector<4x256xf32>
    %c0_3 = arith.constant 0 : index
    %c0_4 = arith.constant 0 : index
    %3 = vector.load %arg3[%c0_3, %c0_4] : memref<4x1xf32, #tpu.memory_space<vmem>>, vector<4x1xf32>
    %4 = vector.broadcast %3 : vector<4x1xf32> to vector<4x256xf32>
    %5 = arith.addf %2, %4 : vector<4x256xf32>
    %c0_5 = arith.constant 0 : index
    %c0_6 = arith.constant 0 : index
    %6 = vector.load %arg4[%c0_5, %c0_6] : memref<4x256xf32, #tpu.memory_space<vmem>>, vector<4x256xf32>
    tpu.vector_store %arg4[%c0_5, %c0_6], %5 {strides = array<i32>} : memref<4x256xf32, #tpu.memory_space<vmem>>, vector<4x256xf32>,
    return
  }
  func.func @transform_0(%arg0: i32) -> (i32, i32) {
    %c0_i32 = arith.constant 0 : i32
    %c0_i32_0 = arith.constant 0 : i32
    %c0_i32_1 = arith.constant 0 : i32
    return %c0_i32, %c0_i32_0 : i32, i32
  }
  func.func @transform_1(%arg0: i32) -> (i32, i32) {
    %c0_i32 = arith.constant 0 : i32
    %c0_i32_0 = arith.constant 0 : i32
    return %c0_i32, %arg0 : i32, i32
  }
  func.func @transform_2(%arg0: i32) -> (i32, i32) {
    %c0_i32 = arith.constant 0 : i32
    %c0_i32_0 = arith.constant 0 : i32
    %c0_i32_1 = arith.constant 0 : i32
    return %c0_i32, %c0_i32_0 : i32, i32
  }
  func.func @transform_3(%arg0: i32) -> (i32, i32) {
    %c0_i32 = arith.constant 0 : i32
    %c0_i32_0 = arith.constant 0 : i32
    return %c0_i32, %arg0 : i32, i32
  }
}

module attributes {stable_mosaic.version = 11 : i64} {
  func.func @_conv_mm_kernel(%arg0: i32, %arg1: memref<8x128xf32, #tpu.memory_space<vmem>>, %arg2: memref<128x128xf32, #tpu.memory_space<vmem>>, %arg3: memref<8x1xf32, #tpu.memory_space<vmem>>, %arg4: memref<8x128xf32, #tpu.memory_space<vmem>>) attributes {dimension_semantics = [#tpu.dimension_semantics<parallel>], iteration_bounds = array<i64: 2>, scalar_prefetch = 0 : i64, scratch_operands = 0 : i64, tpu.core_type = #tpu.core_type<tc>, window_params = [{pipeline_mode = #tpu.pipeline_mode<synchronous>, transform_indices = @transform_0, window_bounds = array<i64: 8, 128>}, {transform_indices = @transform_1, window_bounds = array<i64: 128, 128>}, {pipeline_mode = #tpu.pipeline_mode<synchronous>, transform_indices = @transform_2, window_bounds = array<i64: 8, 1>}, {transform_indices = @transform_3, window_bounds = array<i64: 8, 128>}]} {
    %c0 = arith.constant 0 : index
    %c0_0 = arith.constant 0 : index
    %0 = vector.load %arg1[%c0, %c0_0] : memref<8x128xf32, #tpu.memory_space<vmem>>, vector<8x128xf32>
    %c0_1 = arith.constant 0 : index
    %c0_2 = arith.constant 0 : index
    %1 = vector.load %arg2[%c0_1, %c0_2] : memref<128x128xf32, #tpu.memory_space<vmem>>, vector<128x128xf32>
    %cst = arith.constant dense<0.000000e+00> : vector<8x128xf32>
    %2 = tpu.matmul %0, %1, %cst {dimension_numbers = #tpu.dot_dimension_numbers<[1], [0], [0], [1], [0, 0, 1, 1], [], []>} : vector<8x128xf32>, vector<128x128xf32>, vector<8x128xf32> -> vector<8x128xf32>
    %c0_3 = arith.constant 0 : index
    %c0_4 = arith.constant 0 : index
    %3 = vector.load %arg3[%c0_3, %c0_4] : memref<8x1xf32, #tpu.memory_space<vmem>>, vector<8x1xf32>
    %4 = vector.broadcast %3 : vector<8x1xf32> to vector<8x128xf32>
    %5 = arith.addf %2, %4 : vector<8x128xf32>
    %c0_5 = arith.constant 0 : index
    %c0_6 = arith.constant 0 : index
    %6 = vector.load %arg4[%c0_5, %c0_6] : memref<8x128xf32, #tpu.memory_space<vmem>>, vector<8x128xf32>
    tpu.vector_store %arg4[%c0_5, %c0_6], %5 {strides = array<i32>} : memref<8x128xf32, #tpu.memory_space<vmem>>, vector<8x128xf32>,
    return
  }
  func.func @transform_0(%arg0: i32) -> (i32, i32) {
    %c0_i32 = arith.constant 0 : i32
    %c0_i32_0 = arith.constant 0 : i32
    %c0_i32_1 = arith.constant 0 : i32
    return %c0_i32, %c0_i32_0 : i32, i32
  }
  func.func @transform_1(%arg0: i32) -> (i32, i32) {
    %c0_i32 = arith.constant 0 : i32
    %c0_i32_0 = arith.constant 0 : i32
    return %c0_i32, %arg0 : i32, i32
  }
  func.func @transform_2(%arg0: i32) -> (i32, i32) {
    %c0_i32 = arith.constant 0 : i32
    %c0_i32_0 = arith.constant 0 : i32
    %c0_i32_1 = arith.constant 0 : i32
    return %c0_i32, %c0_i32_0 : i32, i32
  }
  func.func @transform_3(%arg0: i32) -> (i32, i32) {
    %c0_i32 = arith.constant 0 : i32
    %c0_i32_0 = arith.constant 0 : i32
    return %c0_i32, %arg0 : i32, i32
  }
}

module attributes {stable_mosaic.version = 11 : i64} {
  func.func @_conv_mm_kernel(%arg0: i32, %arg1: memref<8x64xf32, #tpu.memory_space<vmem>>, %arg2: memref<64x128xf32, #tpu.memory_space<vmem>>, %arg3: memref<8x1xf32, #tpu.memory_space<vmem>>, %arg4: memref<8x128xf32, #tpu.memory_space<vmem>>) attributes {dimension_semantics = [#tpu.dimension_semantics<parallel>], iteration_bounds = array<i64: 2>, scalar_prefetch = 0 : i64, scratch_operands = 0 : i64, tpu.core_type = #tpu.core_type<tc>, window_params = [{pipeline_mode = #tpu.pipeline_mode<synchronous>, transform_indices = @transform_0, window_bounds = array<i64: 8, 64>}, {transform_indices = @transform_1, window_bounds = array<i64: 64, 128>}, {pipeline_mode = #tpu.pipeline_mode<synchronous>, transform_indices = @transform_2, window_bounds = array<i64: 8, 1>}, {transform_indices = @transform_3, window_bounds = array<i64: 8, 128>}]} {
    %c0 = arith.constant 0 : index
    %c0_0 = arith.constant 0 : index
    %0 = vector.load %arg1[%c0, %c0_0] : memref<8x64xf32, #tpu.memory_space<vmem>>, vector<8x64xf32>
    %c0_1 = arith.constant 0 : index
    %c0_2 = arith.constant 0 : index
    %1 = vector.load %arg2[%c0_1, %c0_2] : memref<64x128xf32, #tpu.memory_space<vmem>>, vector<64x128xf32>
    %cst = arith.constant dense<0.000000e+00> : vector<8x128xf32>
    %2 = tpu.matmul %0, %1, %cst {dimension_numbers = #tpu.dot_dimension_numbers<[1], [0], [0], [1], [0, 0, 1, 1], [], []>} : vector<8x64xf32>, vector<64x128xf32>, vector<8x128xf32> -> vector<8x128xf32>
    %c0_3 = arith.constant 0 : index
    %c0_4 = arith.constant 0 : index
    %3 = vector.load %arg3[%c0_3, %c0_4] : memref<8x1xf32, #tpu.memory_space<vmem>>, vector<8x1xf32>
    %4 = vector.broadcast %3 : vector<8x1xf32> to vector<8x128xf32>
    %5 = arith.addf %2, %4 : vector<8x128xf32>
    %c0_5 = arith.constant 0 : index
    %c0_6 = arith.constant 0 : index
    %6 = vector.load %arg4[%c0_5, %c0_6] : memref<8x128xf32, #tpu.memory_space<vmem>>, vector<8x128xf32>
    tpu.vector_store %arg4[%c0_5, %c0_6], %5 {strides = array<i32>} : memref<8x128xf32, #tpu.memory_space<vmem>>, vector<8x128xf32>,
    return
  }
  func.func @transform_0(%arg0: i32) -> (i32, i32) {
    %c0_i32 = arith.constant 0 : i32
    %c0_i32_0 = arith.constant 0 : i32
    %c0_i32_1 = arith.constant 0 : i32
    return %c0_i32, %c0_i32_0 : i32, i32
  }
  func.func @transform_1(%arg0: i32) -> (i32, i32) {
    %c0_i32 = arith.constant 0 : i32
    %c0_i32_0 = arith.constant 0 : i32
    return %c0_i32, %arg0 : i32, i32
  }
  func.func @transform_2(%arg0: i32) -> (i32, i32) {
    %c0_i32 = arith.constant 0 : i32
    %c0_i32_0 = arith.constant 0 : i32
    %c0_i32_1 = arith.constant 0 : i32
    return %c0_i32, %c0_i32_0 : i32, i32
  }
  func.func @transform_3(%arg0: i32) -> (i32, i32) {
    %c0_i32 = arith.constant 0 : i32
    %c0_i32_0 = arith.constant 0 : i32
    return %c0_i32, %arg0 : i32, i32
  }
}

module attributes {stable_mosaic.version = 11 : i64} {
  func.func @_conv_mm_kernel(%arg0: i32, %arg1: memref<16x144xf32, #tpu.memory_space<vmem>>, %arg2: memref<144x128xf32, #tpu.memory_space<vmem>>, %arg3: memref<16x1xf32, #tpu.memory_space<vmem>>, %arg4: memref<16x128xf32, #tpu.memory_space<vmem>>) attributes {dimension_semantics = [#tpu.dimension_semantics<parallel>], iteration_bounds = array<i64: 2>, scalar_prefetch = 0 : i64, scratch_operands = 0 : i64, tpu.core_type = #tpu.core_type<tc>, window_params = [{pipeline_mode = #tpu.pipeline_mode<synchronous>, transform_indices = @transform_0, window_bounds = array<i64: 16, 144>}, {transform_indices = @transform_1, window_bounds = array<i64: 144, 128>}, {pipeline_mode = #tpu.pipeline_mode<synchronous>, transform_indices = @transform_2, window_bounds = array<i64: 16, 1>}, {transform_indices = @transform_3, window_bounds = array<i64: 16, 128>}]} {
    %c0 = arith.constant 0 : index
    %c0_0 = arith.constant 0 : index
    %0 = vector.load %arg1[%c0, %c0_0] : memref<16x144xf32, #tpu.memory_space<vmem>>, vector<16x144xf32>
    %c0_1 = arith.constant 0 : index
    %c0_2 = arith.constant 0 : index
    %1 = vector.load %arg2[%c0_1, %c0_2] : memref<144x128xf32, #tpu.memory_space<vmem>>, vector<144x128xf32>
    %cst = arith.constant dense<0.000000e+00> : vector<16x128xf32>
    %2 = tpu.matmul %0, %1, %cst {dimension_numbers = #tpu.dot_dimension_numbers<[1], [0], [0], [1], [0, 0, 1, 1], [], []>} : vector<16x144xf32>, vector<144x128xf32>, vector<16x128xf32> -> vector<16x128xf32>
    %c0_3 = arith.constant 0 : index
    %c0_4 = arith.constant 0 : index
    %3 = vector.load %arg3[%c0_3, %c0_4] : memref<16x1xf32, #tpu.memory_space<vmem>>, vector<16x1xf32>
    %4 = vector.broadcast %3 : vector<16x1xf32> to vector<16x128xf32>
    %5 = arith.addf %2, %4 : vector<16x128xf32>
    %cst_5 = arith.constant 0.000000e+00 : f32
    %6 = vector.broadcast %cst_5 : f32 to vector<16x128xf32>
    %7 = arith.maximumf %5, %6 : vector<16x128xf32>
    %c0_6 = arith.constant 0 : index
    %c0_7 = arith.constant 0 : index
    %8 = vector.load %arg4[%c0_6, %c0_7] : memref<16x128xf32, #tpu.memory_space<vmem>>, vector<16x128xf32>
    tpu.vector_store %arg4[%c0_6, %c0_7], %7 {strides = array<i32>} : memref<16x128xf32, #tpu.memory_space<vmem>>, vector<16x128xf32>,
    return
  }
  func.func @transform_0(%arg0: i32) -> (i32, i32) {
    %c0_i32 = arith.constant 0 : i32
    %c0_i32_0 = arith.constant 0 : i32
    %c0_i32_1 = arith.constant 0 : i32
    return %c0_i32, %c0_i32_0 : i32, i32
  }
  func.func @transform_1(%arg0: i32) -> (i32, i32) {
    %c0_i32 = arith.constant 0 : i32
    %c0_i32_0 = arith.constant 0 : i32
    return %c0_i32, %arg0 : i32, i32
  }
  func.func @transform_2(%arg0: i32) -> (i32, i32) {
    %c0_i32 = arith.constant 0 : i32
    %c0_i32_0 = arith.constant 0 : i32
    %c0_i32_1 = arith.constant 0 : i32
    return %c0_i32, %c0_i32_0 : i32, i32
  }
  func.func @transform_3(%arg0: i32) -> (i32, i32) {
    %c0_i32 = arith.constant 0 : i32
    %c0_i32_0 = arith.constant 0 : i32
    return %c0_i32, %arg0 : i32, i32
  }
}

module attributes {stable_mosaic.version = 11 : i64} {
  func.func @_conv_mm_res_relu_kernel(%arg0: i32, %arg1: memref<16x144xf32, #tpu.memory_space<vmem>>, %arg2: memref<144x128xf32, #tpu.memory_space<vmem>>, %arg3: memref<16x1xf32, #tpu.memory_space<vmem>>, %arg4: memref<16x128xf32, #tpu.memory_space<vmem>>, %arg5: memref<16x128xf32, #tpu.memory_space<vmem>>) attributes {dimension_semantics = [#tpu.dimension_semantics<parallel>], iteration_bounds = array<i64: 2>, scalar_prefetch = 0 : i64, scratch_operands = 0 : i64, tpu.core_type = #tpu.core_type<tc>, window_params = [{pipeline_mode = #tpu.pipeline_mode<synchronous>, transform_indices = @transform_0, window_bounds = array<i64: 16, 144>}, {transform_indices = @transform_1, window_bounds = array<i64: 144, 128>}, {pipeline_mode = #tpu.pipeline_mode<synchronous>, transform_indices = @transform_2, window_bounds = array<i64: 16, 1>}, {transform_indices = @transform_3, window_bounds = array<i64: 16, 128>}, {transform_indices = @transform_4, window_bounds = array<i64: 16, 128>}]} {
    %c0 = arith.constant 0 : index
    %c0_0 = arith.constant 0 : index
    %0 = vector.load %arg1[%c0, %c0_0] : memref<16x144xf32, #tpu.memory_space<vmem>>, vector<16x144xf32>
    %c0_1 = arith.constant 0 : index
    %c0_2 = arith.constant 0 : index
    %1 = vector.load %arg2[%c0_1, %c0_2] : memref<144x128xf32, #tpu.memory_space<vmem>>, vector<144x128xf32>
    %cst = arith.constant dense<0.000000e+00> : vector<16x128xf32>
    %2 = tpu.matmul %0, %1, %cst {dimension_numbers = #tpu.dot_dimension_numbers<[1], [0], [0], [1], [0, 0, 1, 1], [], []>} : vector<16x144xf32>, vector<144x128xf32>, vector<16x128xf32> -> vector<16x128xf32>
    %c0_3 = arith.constant 0 : index
    %c0_4 = arith.constant 0 : index
    %3 = vector.load %arg3[%c0_3, %c0_4] : memref<16x1xf32, #tpu.memory_space<vmem>>, vector<16x1xf32>
    %4 = vector.broadcast %3 : vector<16x1xf32> to vector<16x128xf32>
    %5 = arith.addf %2, %4 : vector<16x128xf32>
    %c0_5 = arith.constant 0 : index
    %c0_6 = arith.constant 0 : index
    %6 = vector.load %arg4[%c0_5, %c0_6] : memref<16x128xf32, #tpu.memory_space<vmem>>, vector<16x128xf32>
    %7 = arith.addf %5, %6 : vector<16x128xf32>
    %cst_7 = arith.constant 0.000000e+00 : f32
    %8 = vector.broadcast %cst_7 : f32 to vector<16x128xf32>
    %9 = arith.maximumf %7, %8 : vector<16x128xf32>
    %c0_8 = arith.constant 0 : index
    %c0_9 = arith.constant 0 : index
    %10 = vector.load %arg5[%c0_8, %c0_9] : memref<16x128xf32, #tpu.memory_space<vmem>>, vector<16x128xf32>
    tpu.vector_store %arg5[%c0_8, %c0_9], %9 {strides = array<i32>} : memref<16x128xf32, #tpu.memory_space<vmem>>, vector<16x128xf32>,
    return
  }
  func.func @transform_0(%arg0: i32) -> (i32, i32) {
    %c0_i32 = arith.constant 0 : i32
    %c0_i32_0 = arith.constant 0 : i32
    %c0_i32_1 = arith.constant 0 : i32
    return %c0_i32, %c0_i32_0 : i32, i32
  }
  func.func @transform_1(%arg0: i32) -> (i32, i32) {
    %c0_i32 = arith.constant 0 : i32
    %c0_i32_0 = arith.constant 0 : i32
    return %c0_i32, %arg0 : i32, i32
  }
  func.func @transform_2(%arg0: i32) -> (i32, i32) {
    %c0_i32 = arith.constant 0 : i32
    %c0_i32_0 = arith.constant 0 : i32
    %c0_i32_1 = arith.constant 0 : i32
    return %c0_i32, %c0_i32_0 : i32, i32
  }
  func.func @transform_3(%arg0: i32) -> (i32, i32) {
    %c0_i32 = arith.constant 0 : i32
    %c0_i32_0 = arith.constant 0 : i32
    return %c0_i32, %arg0 : i32, i32
  }
  func.func @transform_4(%arg0: i32) -> (i32, i32) {
    %c0_i32 = arith.constant 0 : i32
    %c0_i32_0 = arith.constant 0 : i32
    return %c0_i32, %arg0 : i32, i32
  }
}

module attributes {stable_mosaic.version = 11 : i64} {
  func.func @_conv_mm_kernel(%arg0: i32, %arg1: memref<16x144xf32, #tpu.memory_space<vmem>>, %arg2: memref<144x42xf32, #tpu.memory_space<vmem>>, %arg3: memref<16x1xf32, #tpu.memory_space<vmem>>, %arg4: memref<16x42xf32, #tpu.memory_space<vmem>>) attributes {dimension_semantics = [#tpu.dimension_semantics<parallel>], iteration_bounds = array<i64: 1>, scalar_prefetch = 0 : i64, scratch_operands = 0 : i64, tpu.core_type = #tpu.core_type<tc>, window_params = [{pipeline_mode = #tpu.pipeline_mode<synchronous>, transform_indices = @transform_0, window_bounds = array<i64: 16, 144>}, {transform_indices = @transform_1, window_bounds = array<i64: 144, 42>}, {pipeline_mode = #tpu.pipeline_mode<synchronous>, transform_indices = @transform_2, window_bounds = array<i64: 16, 1>}, {transform_indices = @transform_3, window_bounds = array<i64: 16, 42>}]} {
    %c0 = arith.constant 0 : index
    %c0_0 = arith.constant 0 : index
    %0 = vector.load %arg1[%c0, %c0_0] : memref<16x144xf32, #tpu.memory_space<vmem>>, vector<16x144xf32>
    %c0_1 = arith.constant 0 : index
    %c0_2 = arith.constant 0 : index
    %1 = vector.load %arg2[%c0_1, %c0_2] : memref<144x42xf32, #tpu.memory_space<vmem>>, vector<144x42xf32>
    %cst = arith.constant dense<0.000000e+00> : vector<16x42xf32>
    %2 = tpu.matmul %0, %1, %cst {dimension_numbers = #tpu.dot_dimension_numbers<[1], [0], [0], [1], [0, 0, 1, 1], [], []>} : vector<16x144xf32>, vector<144x42xf32>, vector<16x42xf32> -> vector<16x42xf32>
    %c0_3 = arith.constant 0 : index
    %c0_4 = arith.constant 0 : index
    %3 = vector.load %arg3[%c0_3, %c0_4] : memref<16x1xf32, #tpu.memory_space<vmem>>, vector<16x1xf32>
    %4 = vector.broadcast %3 : vector<16x1xf32> to vector<16x42xf32>
    %5 = arith.addf %2, %4 : vector<16x42xf32>
    %c0_5 = arith.constant 0 : index
    %c0_6 = arith.constant 0 : index
    %6 = vector.load %arg4[%c0_5, %c0_6] : memref<16x42xf32, #tpu.memory_space<vmem>>, vector<16x42xf32>
    tpu.vector_store %arg4[%c0_5, %c0_6], %5 {strides = array<i32>} : memref<16x42xf32, #tpu.memory_space<vmem>>, vector<16x42xf32>,
    return
  }
  func.func @transform_0(%arg0: i32) -> (i32, i32) {
    %c0_i32 = arith.constant 0 : i32
    %c0_i32_0 = arith.constant 0 : i32
    %c0_i32_1 = arith.constant 0 : i32
    return %c0_i32, %c0_i32_0 : i32, i32
  }
  func.func @transform_1(%arg0: i32) -> (i32, i32) {
    %c0_i32 = arith.constant 0 : i32
    %c0_i32_0 = arith.constant 0 : i32
    return %c0_i32, %arg0 : i32, i32
  }
  func.func @transform_2(%arg0: i32) -> (i32, i32) {
    %c0_i32 = arith.constant 0 : i32
    %c0_i32_0 = arith.constant 0 : i32
    %c0_i32_1 = arith.constant 0 : i32
    return %c0_i32, %c0_i32_0 : i32, i32
  }
  func.func @transform_3(%arg0: i32) -> (i32, i32) {
    %c0_i32 = arith.constant 0 : i32
    %c0_i32_0 = arith.constant 0 : i32
    return %c0_i32, %arg0 : i32, i32
  }
}

module attributes {stable_mosaic.version = 11 : i64} {
  func.func @_conv_mm_kernel(%arg0: i32, %arg1: memref<8x144xf32, #tpu.memory_space<vmem>>, %arg2: memref<144x10xf32, #tpu.memory_space<vmem>>, %arg3: memref<8x1xf32, #tpu.memory_space<vmem>>, %arg4: memref<8x10xf32, #tpu.memory_space<vmem>>) attributes {dimension_semantics = [#tpu.dimension_semantics<parallel>], iteration_bounds = array<i64: 1>, scalar_prefetch = 0 : i64, scratch_operands = 0 : i64, tpu.core_type = #tpu.core_type<tc>, window_params = [{pipeline_mode = #tpu.pipeline_mode<synchronous>, transform_indices = @transform_0, window_bounds = array<i64: 8, 144>}, {transform_indices = @transform_1, window_bounds = array<i64: 144, 10>}, {pipeline_mode = #tpu.pipeline_mode<synchronous>, transform_indices = @transform_2, window_bounds = array<i64: 8, 1>}, {transform_indices = @transform_3, window_bounds = array<i64: 8, 10>}]} {
    %c0 = arith.constant 0 : index
    %c0_0 = arith.constant 0 : index
    %0 = vector.load %arg1[%c0, %c0_0] : memref<8x144xf32, #tpu.memory_space<vmem>>, vector<8x144xf32>
    %c0_1 = arith.constant 0 : index
    %c0_2 = arith.constant 0 : index
    %1 = vector.load %arg2[%c0_1, %c0_2] : memref<144x10xf32, #tpu.memory_space<vmem>>, vector<144x10xf32>
    %cst = arith.constant dense<0.000000e+00> : vector<8x10xf32>
    %2 = tpu.matmul %0, %1, %cst {dimension_numbers = #tpu.dot_dimension_numbers<[1], [0], [0], [1], [0, 0, 1, 1], [], []>} : vector<8x144xf32>, vector<144x10xf32>, vector<8x10xf32> -> vector<8x10xf32>
    %c0_3 = arith.constant 0 : index
    %c0_4 = arith.constant 0 : index
    %3 = vector.load %arg3[%c0_3, %c0_4] : memref<8x1xf32, #tpu.memory_space<vmem>>, vector<8x1xf32>
    %4 = vector.broadcast %3 : vector<8x1xf32> to vector<8x10xf32>
    %5 = arith.addf %2, %4 : vector<8x10xf32>
    %c0_5 = arith.constant 0 : index
    %c0_6 = arith.constant 0 : index
    %6 = vector.load %arg4[%c0_5, %c0_6] : memref<8x10xf32, #tpu.memory_space<vmem>>, vector<8x10xf32>
    tpu.vector_store %arg4[%c0_5, %c0_6], %5 {strides = array<i32>} : memref<8x10xf32, #tpu.memory_space<vmem>>, vector<8x10xf32>,
    return
  }
  func.func @transform_0(%arg0: i32) -> (i32, i32) {
    %c0_i32 = arith.constant 0 : i32
    %c0_i32_0 = arith.constant 0 : i32
    %c0_i32_1 = arith.constant 0 : i32
    return %c0_i32, %c0_i32_0 : i32, i32
  }
  func.func @transform_1(%arg0: i32) -> (i32, i32) {
    %c0_i32 = arith.constant 0 : i32
    %c0_i32_0 = arith.constant 0 : i32
    return %c0_i32, %arg0 : i32, i32
  }
  func.func @transform_2(%arg0: i32) -> (i32, i32) {
    %c0_i32 = arith.constant 0 : i32
    %c0_i32_0 = arith.constant 0 : i32
    %c0_i32_1 = arith.constant 0 : i32
    return %c0_i32, %c0_i32_0 : i32, i32
  }
  func.func @transform_3(%arg0: i32) -> (i32, i32) {
    %c0_i32 = arith.constant 0 : i32
    %c0_i32_0 = arith.constant 0 : i32
    return %c0_i32, %arg0 : i32, i32
  }
}

</mosaic_0001>

<bundles_post_ra>
// kernel: features_extractor.8
= control target key start
LH: loop header
LB: loop body
LE: loop exit
PB: predicated region body
PF: predicated region fallthrough
CT: control target
= control target key end

     0   :  { %s351_s12 = smov 0   ;;  %s374_s0 = inlined_call_operand.vmem [shape: f32[4,5], index: 0, kind: input, shape index: {}]   ;;  %s375_s1 = inlined_call_operand.vmem [shape: f32[5,512], index: 1, kind: input, shape index: {}]   ;;  %s376_s2 = inlined_call_operand.vmem [shape: f32[4,1], index: 2, kind: input, shape index: {}]   ;;  %s377_s3 = inlined_call_operand.vmem [shape: f32[4,512], index: 3, kind: output, shape index: {}]  }
   0x1 LB: > { %s297_s13 = sadd.s32 4294967295, %s328_s12   ;;  %p301_p0 = scmp.ge.s32.totalorder %s328_s12, 1  ;;  %s328_s12 = sphi %s351_s12, %s13_s12  }
   0x2   : > { %p138_p1 = scmp.lt.s32.totalorder %s328_s12, 3 }
   0x4   : > { %p139_p2 = pnand %p301_p0, %p138_p1 }
   0x5   : > { %s302_s14 = sshll.u32 (!%p139_p2), %s297_s13, 1 }
   0x6   : > { %142 = sbr.rel (%p139_p2) target bundleno = 148 (0x94), region = 32  ;;  %p163_p3 = scmp.lt.s32.totalorder (!%p139_p2), %s302_s14, 3 }
   0xb   : > { %v330_v0 = vmov 0   ;;  %v177_v1 = vld [vmem:[%s376_s2] sm:$0xf]  ;;  %s379_s14 = smov (!%p163_p3, %s302_s14), 3  ;;  %vm187_vm0 = vcmask 1044480   ;;  %vm183_vm1 = vcmask 39936  }
   0xc   : > { %321 = vset.pattern.permute.xlu0 %v330_v0  ;;  %s303_s17 = sshll.u32 %s379_s14, 3  ;;  %v174_v2 = vld [vmem:[%s374_s0] sm:$0xf]  ;;  %s305_s23 = sshll.u32 %s379_s14, 2  ;;  %vm237_vm2 = vcmask 1043456  }
   0xd   : > { %180 = vperm.xlu0 %321, %v177_v1   ;;  %s166_s20 = scalar_lea.vmem %s375_s1, %s303_s17  ;;  %s172_s26 = scalar_lea.vmem %s377_s3, %s305_s23 }
   0xe   : > { %v175_v3 = vld [vmem:[%s166_s20] sm:$0x1f]  ;;  %v176_v4 = vld [vmem:[%s166_s20 + $0x8] sm:$0x1f] }
   0xf   : > { %306 = vmatpush.msk.msra.mxu0 %vm187_vm0, %v175_v3  ;;  %308 = vmatpush.msk.msra.mxu1 %vm187_vm0, %v176_v4 }
  0x10   : > { %307 = vmatmul.msk.f32.vlgmr.msra.gmra.mxu0 %vm183_vm1, %v174_v2  ;;  %309 = vmatmul.msk.f32.vlgmr.msra.gmra.mxu1 %vm183_vm1, %v174_v2 }
  0x7f   : > { %v181_v5 = vpop.permute.xlu0 %180 }
  0x8d   : > { %v211_v6 = vpop.f32.mrf.mxu0  ;;  %v231_v7 = vpop.f32.mrf.mxu1 }
  0x8e   : > { %v232_v8 = vadd.f32 %v231_v7, %v181_v5  ;;  %v212_v9 = vadd.f32 %v211_v6, %v181_v5 }
  0x90   : > { %v236_v10 = vrot.slane %v232_v8, 4 }
  0x92   : > { %v238_v11 = vsel %vm237_vm2, %v212_v9, %v236_v10 }
  0x93   : > { %240 = vst [vmem:[%s172_s26] sm:$0xff] %v238_v11 }
  0x94 PF: > { %s13_s12 = sadd.s32 1, %s328_s12  }
  0x95   : > { %p10_p4 = scmp.ge.s32.totalorder %s13_s12, 4  }
  0x97   :  { %12 = sbr.rel (!%p10_p4) target bundleno = 1 (0x1), region = 62 }

// kernel: features_extractor.10
= control target key start
LH: loop header
LB: loop body
LE: loop exit
PB: predicated region body
PF: predicated region fallthrough
CT: control target
= control target key end

     0   :  { %s449_s12 = smov 0   ;;  %s451_s13 = smov 0   ;;  %s545_s0 = inlined_call_operand.vmem [shape: f32[8,128], index: 0, kind: input, shape index: {}]   ;;  %s546_s1 = inlined_call_operand.vmem [shape: f32[128,256], index: 1, kind: input, shape index: {}]   ;;  %s547_s2 = inlined_call_operand.vmem [shape: f32[8,1], index: 2, kind: input, shape index: {}]   ;;  %s548_s3 = inlined_call_operand.vmem [shape: f32[8,256], index: 3, kind: output, shape index: {}]  }
   0x1   :  { %s453_s14 = smov 0  }
   0x2 LB: > { %s367_s15 = sadd.s32 4294967295, %s426_s14   ;;  %s466_s16 = sadd.s32 1, %s426_s14   ;;  %s426_s14 = sphi %s453_s14, %s551_s14   ;;  %s422_s13 = sphi %s451_s13, %s550_s13   ;;  %s418_s12 = sphi %s449_s12, %s549_s12  }
   0x3   : > { %s38_s17 = ssub.s32 %s426_s14, %s466_s16  ;;  %s41_s18 = sadd.s32 1, %s422_s13 }
   0x4   : > { %p39_p0 = scmp.eq.s32.totalorder %s38_s17, 0  ;;  %p48_p1 = scmp.ne.s32.totalorder %s422_s13, %s418_s12 }
   0x5   : > { %p49_p2 = scmp.eq.s32.totalorder %s426_s14, 0  ;;  %p370_p4 = scmp.ge.s32.totalorder %s426_s14, 2 }
   0x6   : > { %s475_s19 = scalar_select %p39_p0, %s422_s13, %s41_s18  }
   0x7   : > { %p50_p3 = por %p49_p2, %p48_p1  ;;  %127 = sbr.rel (%p370_p4) target bundleno = 32 (0x20), region = 24 }
   0xc   : > { %130 = sbr.rel (!%p50_p3) target bundleno = 32 (0x20), region = 28  ;;  %s132_s20 = sand.u32 (%p50_p3), 1, %s422_s13  }
   0xd   : > { %s372_s21 = sshll.u32 (%p50_p3), %s426_s14, 3  ;;  %s371_s22 = sshll.u32 (%p50_p3), %s132_s20, 7 }
   0xe   : > { %s483_s25 = scalar_lea.vmem (%p50_p3), %s546_s1, %s372_s21  ;;  %s134_s26 = scalar_lea.vmem (%p50_p3), [#allocation2], %s371_s22 }
   0xf   : > { %v195_v0 = vld [vmem:[%s483_s25] sm:$0xff] (%p50_p3)  ;;  %v197_v1 = vld [vmem:[%s483_s25 + $0x10] sm:$0xff] (%p50_p3) }
  0x10   : > { %v199_v2 = vld [vmem:[%s483_s25 + $0x20] sm:$0xff] (%p50_p3)  ;;  %196 = vst [vmem:[%s134_s26] sm:$0xff] (%p50_p3), %v195_v0  ;;  %v201_v3 = vld [vmem:[%s483_s25 + $0x30] sm:$0xff] (%p50_p3) }
  0x11   : > { %198 = vst [vmem:[%s134_s26 + $0x8] sm:$0xff] %v197_v1  ;;  %v203_v4 = vld [vmem:[%s483_s25 + $0x40] sm:$0xff]  ;;  %v205_v5 = vld [vmem:[%s483_s25 + $0x50] sm:$0xff] }
  0x12   : > { %200 = vst [vmem:[%s134_s26 + $0x10] sm:$0xff] %v199_v2  ;;  %v207_v6 = vld [vmem:[%s483_s25 + $0x60] sm:$0xff]  ;;  %v209_v7 = vld [vmem:[%s483_s25 + $0x70] sm:$0xff] }
  0x13   : > { %202 = vst [vmem:[%s134_s26 + $0x18] sm:$0xff] %v201_v3  ;;  %v211_v8 = vld [vmem:[%s483_s25 + $0x80] sm:$0xff]  ;;  %v213_v9 = vld [vmem:[%s483_s25 + $0x90] sm:$0xff] }
  0x14   : > { %204 = vst [vmem:[%s134_s26 + $0x20] sm:$0xff] %v203_v4  ;;  %v215_v10 = vld [vmem:[%s483_s25 + $0xa0] sm:$0xff]  ;;  %v217_v11 = vld [vmem:[%s483_s25 + $0xb0] sm:$0xff] }
  0x15   : > { %206 = vst [vmem:[%s134_s26 + $0x28] sm:$0xff] %v205_v5  ;;  %v219_v12 = vld [vmem:[%s483_s25 + $0xc0] sm:$0xff]  ;;  %v221_v13 = vld [vmem:[%s483_s25 + $0xd0] sm:$0xff] }
  0x16   : > { %208 = vst [vmem:[%s134_s26 + $0x30] sm:$0xff] %v207_v6  ;;  %v223_v14 = vld [vmem:[%s483_s25 + $0xe0] sm:$0xff]  ;;  %v225_v15 = vld [vmem:[%s483_s25 + $0xf0] sm:$0xff] }
  0x17   : > { %210 = vst [vmem:[%s134_s26 + $0x38] sm:$0xff] %v209_v7 }
  0x18   : > { %212 = vst [vmem:[%s134_s26 + $0x40] sm:$0xff] %v211_v8 }
  0x19   : > { %214 = vst [vmem:[%s134_s26 + $0x48] sm:$0xff] %v213_v9 }
  0x1a   : > { %216 = vst [vmem:[%s134_s26 + $0x50] sm:$0xff] %v215_v10 }
  0x1b   : > { %218 = vst [vmem:[%s134_s26 + $0x58] sm:$0xff] %v217_v11 }
  0x1c   : > { %220 = vst [vmem:[%s134_s26 + $0x60] sm:$0xff] %v219_v12 }
  0x1d   : > { %222 = vst [vmem:[%s134_s26 + $0x68] sm:$0xff] %v221_v13 }
  0x1e   : > { %224 = vst [vmem:[%s134_s26 + $0x70] sm:$0xff] %v223_v14 }
  0x1f   : > { %226 = vst [vmem:[%s134_s26 + $0x78] sm:$0xff] %v225_v15 }
  0x20 PF: > { %p373_p5 = scmp.ge.s32.totalorder %s426_s14, 1  ;;  %p231_p6 = scmp.lt.s32.totalorder %s426_s14, 3 }
  0x22   : > { %p232_p7 = pnand %p373_p5, %p231_p6 }
  0x23   : > { %s238_s27 = sand.u32 (!%p232_p7), 1, %s418_s12   ;;  %p260_p8 = scmp.lt.s32.totalorder (!%p232_p7), %s367_s15, 1 }
  0x24   : > { %235 = sbr.rel (%p232_p7) target bundleno = 202 (0xca), region = 66  ;;  %s374_s28 = sshll.u32 (!%p232_p7), %s238_s27, 7 }
  0x25   : > { %s504_s29 = scalar_lea.vmem (!%p232_p7), [#allocation2], %s374_s28 }
  0x29   : > { %v280_v16 = vld [vmem:[%s504_s29 + $0x78] sm:$0xff]  ;;  %v279_v17 = vld [vmem:[%s504_s29 + $0x70] sm:$0xff]  ;;  %v428_v18 = vmov 0   ;;  %v278_v19 = vld [vmem:[%s504_s29 + $0x68] sm:$0xff]  ;;  %s553_s15 = smov (!%p260_p8, %s367_s15), 1 }
  0x2a   : > { %287 = vmatpush.msra.mxu0 %v280_v16  ;;  %403 = vset.pattern.permute.xlu0 %v428_v18  ;;  %v277_v20 = vld [vmem:[%s504_s29 + $0x60] sm:$0xff]  ;;  %v276_v22 = vld [vmem:[%s504_s29 + $0x58] sm:$0xff]  ;;  %v275_v23 = vld [vmem:[%s504_s29 + $0x50] sm:$0xff]  ;;  %s375_s7 = sshll.u32 %s553_s15, 3 }
  0x2b   : > { %v281_v21 = vld [vmem:[%s547_s2] sm:$0xff]  ;;  %v274_v24 = vld [vmem:[%s504_s29 + $0x48] sm:$0xff]  ;;  %v272_v26 = vld [vmem:[%s504_s29 + $0x38] sm:$0xff]  ;;  %s263_s10 = scalar_lea.vmem %s548_s3, %s375_s7 }
  0x2c   : > { %288 = vmatpush.msra.mxu0 %v279_v17  ;;  %284 = vperm.xlu0 %403, %v281_v21   ;;  %v273_v25 = vld [vmem:[%s504_s29 + $0x40] sm:$0xff]  ;;  %v271_v27 = vld [vmem:[%s504_s29 + $0x30] sm:$0xff]  ;;  %v270_v28 = vld [vmem:[%s504_s29 + $0x28] sm:$0xff] }
  0x2d   : > { %v269_v29 = vld [vmem:[%s504_s29 + $0x20] sm:$0xff]  ;;  %v268_v30 = vld [vmem:[%s504_s29 + $0x18] sm:$0xff]  ;;  %v267_v31 = vld [vmem:[%s504_s29 + $0x10] sm:$0xff] }
  0x2e   : > { %289 = vmatpush.msra.mxu0 %v278_v19  ;;  %v266_v32 = vld [vmem:[%s504_s29 + $0x8] sm:$0xff]  ;;  %v265_v33 = vld [vmem:[%s504_s29] sm:$0xff] }
  0x2f   : > { %v264_v34 = vld [vmem:[%s545_s0] sm:$0xff] }
  0x30   : > { %290 = vmatpush.msra.mxu0 %v277_v20 }
  0x32   : > { %291 = vmatpush.msra.mxu0 %v276_v22 }
  0x34   : > { %292 = vmatpush.msra.mxu0 %v275_v23 }
  0x36   : > { %293 = vmatpush.msra.mxu0 %v274_v24 }
  0x38   : > { %294 = vmatpush.msra.mxu0 %v273_v25 }
  0x3a   : > { %295 = vmatpush.msra.mxu0 %v272_v26 }
  0x3c   : > { %296 = vmatpush.msra.mxu0 %v271_v27 }
  0x3e   : > { %297 = vmatpush.msra.mxu0 %v270_v28 }
  0x40   : > { %298 = vmatpush.msra.mxu0 %v269_v29 }
  0x42   : > { %299 = vmatpush.msra.mxu0 %v268_v30 }
  0x44   : > { %300 = vmatpush.msra.mxu0 %v267_v31 }
  0x46   : > { %301 = vmatpush.msra.mxu0 %v266_v32 }
  0x48   : > { %302 = vmatpush.msra.mxu0 %v265_v33 }
  0x49   : > { %303 = vmatmul.f32.vlgmr.msra.gmra.mxu0 %v264_v34 }
  0x9e   : > { %v285_v35 = vpop.permute.xlu0 %284 }
  0xc6   : > { %v304_v36 = vpop.f32.mrf.mxu0 }
  0xc7   : > { %v305_v37 = vadd.f32 %v304_v36, %v285_v35 }
  0xc9   : > { %307 = vst [vmem:[%s263_s10] sm:$0xff] %v305_v37 }
  0xca PF: > { %p10_p9 = scmp.ge.s32.totalorder %s466_s16, 4   ;;  %s549_s12 = smov %s422_s13 }
  0xcb   : > { %s550_s13 = smov %s475_s19  ;;  %s551_s14 = smov %s466_s16 }
  0xcc   :  { %12 = sbr.rel (!%p10_p9) target bundleno = 2 (0x2), region = 105 }

// kernel: features_extractor.11
= control target key start
LH: loop header
LB: loop body
LE: loop exit
PB: predicated region body
PF: predicated region fallthrough
CT: control target
= control target key end

     0   :  { %s414_s12 = smov 0   ;;  %s416_s13 = smov 0   ;;  %s474_s0 = inlined_call_operand.vmem [shape: f32[8,64], index: 0, kind: input, shape index: {}]   ;;  %s475_s1 = inlined_call_operand.vmem [shape: f32[64,256], index: 1, kind: input, shape index: {}]   ;;  %s476_s2 = inlined_call_operand.vmem [shape: f32[8,1], index: 2, kind: input, shape index: {}]   ;;  %s477_s3 = inlined_call_operand.vmem [shape: f32[8,256], index: 3, kind: output, shape index: {}]  }
   0x1   :  { %s418_s14 = smov 0  }
   0x2 LB: > { %s331_s15 = sadd.s32 4294967295, %s391_s14   ;;  %s431_s16 = sadd.s32 1, %s391_s14   ;;  %s391_s14 = sphi %s418_s14, %s480_s14   ;;  %s387_s13 = sphi %s416_s13, %s479_s13   ;;  %s383_s12 = sphi %s414_s12, %s478_s12  }
   0x3   : > { %s38_s17 = ssub.s32 %s391_s14, %s431_s16  ;;  %s41_s18 = sadd.s32 1, %s387_s13 }
   0x4   : > { %p39_p0 = scmp.eq.s32.totalorder %s38_s17, 0  ;;  %p48_p1 = scmp.ne.s32.totalorder %s387_s13, %s383_s12 }
   0x5   : > { %p49_p2 = scmp.eq.s32.totalorder %s391_s14, 0  ;;  %p334_p4 = scmp.ge.s32.totalorder %s391_s14, 2 }
   0x6   : > { %s440_s19 = scalar_select %p39_p0, %s387_s13, %s41_s18  }
   0x7   : > { %p50_p3 = por %p49_p2, %p48_p1  ;;  %127 = sbr.rel (%p334_p4) target bundleno = 24 (0x18), region = 24 }
   0xc   : > { %130 = sbr.rel (!%p50_p3) target bundleno = 24 (0x18), region = 28  ;;  %s132_s20 = sand.u32 (%p50_p3), 1, %s387_s13  }
   0xd   : > { %s336_s21 = sshll.u32 (%p50_p3), %s391_s14, 3  ;;  %s335_s22 = sshll.u32 (%p50_p3), %s132_s20, 6 }
   0xe   : > { %s136_s25 = scalar_lea.vmem (%p50_p3), %s475_s1, %s336_s21  ;;  %s134_s26 = scalar_lea.vmem (%p50_p3), [#allocation2], %s335_s22 }
   0xf   : > { %v179_v0 = vld [vmem:[%s136_s25] sm:$0xff] (%p50_p3)  ;;  %v181_v1 = vld [vmem:[%s136_s25 + $0x10] sm:$0xff] (%p50_p3) }
  0x10   : > { %v183_v2 = vld [vmem:[%s136_s25 + $0x20] sm:$0xff] (%p50_p3)  ;;  %180 = vst [vmem:[%s134_s26] sm:$0xff] (%p50_p3), %v179_v0  ;;  %v185_v3 = vld [vmem:[%s136_s25 + $0x30] sm:$0xff] (%p50_p3) }
  0x11   : > { %182 = vst [vmem:[%s134_s26 + $0x8] sm:$0xff] %v181_v1  ;;  %v187_v4 = vld [vmem:[%s136_s25 + $0x40] sm:$0xff]  ;;  %v189_v5 = vld [vmem:[%s136_s25 + $0x50] sm:$0xff] }
  0x12   : > { %184 = vst [vmem:[%s134_s26 + $0x10] sm:$0xff] %v183_v2  ;;  %v191_v6 = vld [vmem:[%s136_s25 + $0x60] sm:$0xff]  ;;  %v193_v7 = vld [vmem:[%s136_s25 + $0x70] sm:$0xff] }
  0x13   : > { %186 = vst [vmem:[%s134_s26 + $0x18] sm:$0xff] %v185_v3 }
  0x14   : > { %188 = vst [vmem:[%s134_s26 + $0x20] sm:$0xff] %v187_v4 }
  0x15   : > { %190 = vst [vmem:[%s134_s26 + $0x28] sm:$0xff] %v189_v5 }
  0x16   : > { %192 = vst [vmem:[%s134_s26 + $0x30] sm:$0xff] %v191_v6 }
  0x17   : > { %194 = vst [vmem:[%s134_s26 + $0x38] sm:$0xff] %v193_v7 }
  0x18 PF: > { %p337_p5 = scmp.ge.s32.totalorder %s391_s14, 1  ;;  %p199_p6 = scmp.lt.s32.totalorder %s391_s14, 3 }
  0x1a   : > { %p200_p7 = pnand %p337_p5, %p199_p6 }
  0x1b   : > { %s206_s27 = sand.u32 (!%p200_p7), 1, %s383_s12   ;;  %p228_p8 = scmp.lt.s32.totalorder (!%p200_p7), %s331_s15, 1 }
  0x1c   : > { %203 = sbr.rel (%p200_p7) target bundleno = 178 (0xb2), region = 66  ;;  %s338_s30 = sshll.u32 (!%p200_p7), %s206_s27, 6 }
  0x1d   : > { %s208_s4 = scalar_lea.vmem (!%p200_p7), [#allocation2], %s338_s30 }
  0x21   : > { %v241_v8 = vld [vmem:[%s476_s2] sm:$0xff]  ;;  %v393_v9 = vmov 0   ;;  %v240_v10 = vld [vmem:[%s208_s4 + $0x38] sm:$0xff]  ;;  %v239_v11 = vld [vmem:[%s208_s4 + $0x30] sm:$0xff]  ;;  %vm247_vm0 = vcmask 523264   ;;  %s482_s15 = smov (!%p228_p8, %s331_s15), 1 }
  0x22   : > { %368 = vset.pattern.permute.xlu0 %v393_v9  ;;  %259 = vmatpush.msra.mxu0 %v240_v10  ;;  %v238_v12 = vld [vmem:[%s208_s4 + $0x28] sm:$0xff]  ;;  %v237_v13 = vld [vmem:[%s208_s4 + $0x20] sm:$0xff]  ;;  %v236_v14 = vld [vmem:[%s208_s4 + $0x18] sm:$0xff]  ;;  %s339_s7 = sshll.u32 %s482_s15, 3 }
  0x23   : > { %244 = vperm.xlu0 %368, %v241_v8   ;;  %v235_v15 = vld [vmem:[%s208_s4 + $0x10] sm:$0xff]  ;;  %v234_v16 = vld [vmem:[%s208_s4 + $0x8] sm:$0xff]  ;;  %v233_v17 = vld [vmem:[%s208_s4] sm:$0xff]  ;;  %s231_s10 = scalar_lea.vmem %s477_s3, %s339_s7 }
  0x24   : > { %260 = vmatpush.msra.mxu0 %v239_v11  ;;  %v232_v18 = vld [vmem:[%s474_s0] sm:$0xff] }
  0x26   : > { %261 = vmatpush.msra.mxu0 %v238_v12 }
  0x28   : > { %262 = vmatpush.msra.mxu0 %v237_v13 }
  0x2a   : > { %263 = vmatpush.msra.mxu0 %v236_v14 }
  0x2c   : > { %264 = vmatpush.msra.mxu0 %v235_v15 }
  0x2e   : > { %265 = vmatpush.msra.mxu0 %v234_v16 }
  0x30   : > { %266 = vmatpush.msra.mxu0 %v233_v17 }
  0x31   : > { %340 = vmatmul.msk.f32.vlgmr.msra.gmra.mxu0 %vm247_vm0, %v232_v18 }
  0x95   : > { %v245_v19 = vpop.permute.xlu0 %244 }
  0xae   : > { %v268_v20 = vpop.f32.mrf.mxu0 }
  0xaf   : > { %v269_v21 = vadd.f32 %v268_v20, %v245_v19 }
  0xb1   : > { %271 = vst [vmem:[%s231_s10] sm:$0xff] %v269_v21 }
  0xb2 PF: > { %p10_p9 = scmp.ge.s32.totalorder %s431_s16, 4   ;;  %s478_s12 = smov %s387_s13 }
  0xb3   : > { %s479_s13 = smov %s440_s19  ;;  %s480_s14 = smov %s431_s16 }
  0xb4   :  { %12 = sbr.rel (!%p10_p9) target bundleno = 2 (0x2), region = 105 }

// kernel: features_extractor.12
= control target key start
LH: loop header
LB: loop body
LE: loop exit
PB: predicated region body
PF: predicated region fallthrough
CT: control target
= control target key end

     0   :  { %s563_s12 = smov 0   ;;  %s565_s13 = smov 0   ;;  %s707_s0 = inlined_call_operand.vmem [shape: f32[16,144], index: 0, kind: input, shape index: {}]   ;;  %s708_s1 = inlined_call_operand.vmem [shape: f32[144,256], index: 1, kind: input, shape index: {}]   ;;  %s709_s2 = inlined_call_operand.vmem [shape: f32[16,1], index: 2, kind: input, shape index: {}]   ;;  %s710_s3 = inlined_call_operand.vmem [shape: f32[16,256], index: 3, kind: output, shape index: {}]  }
   0x1   :  { %s567_s14 = smov 0  }
   0x2 LB: > { %s461_s15 = sadd.s32 4294967295, %s540_s14   ;;  %s580_s16 = sadd.s32 1, %s540_s14   ;;  %s540_s14 = sphi %s567_s14, %s714_s14   ;;  %s536_s13 = sphi %s565_s13, %s713_s13   ;;  %s532_s12 = sphi %s563_s12, %s712_s12  }
   0x3   : > { %s38_s17 = ssub.s32 %s540_s14, %s580_s16  ;;  %s41_s18 = sadd.s32 1, %s536_s13 }
   0x4   : > { %p39_p0 = scmp.eq.s32.totalorder %s38_s17, 0  ;;  %p48_p1 = scmp.ne.s32.totalorder %s536_s13, %s532_s12 }
   0x5   : > { %p49_p2 = scmp.eq.s32.totalorder %s540_s14, 0  ;;  %p99_p3 = scmp.eq.s32.totalorder %s461_s15, 1 }
   0x6   : > { %s591_s19 = scalar_select %p39_p0, %s536_s13, %s41_s18  }
   0x7   : > { %p50_p4 = por %p49_p2, %p48_p1  ;;  %p593_p5 = por %p99_p3, %p48_p1 }
   0x8   : > { %p464_p6 = scmp.ge.s32.totalorder %s540_s14, 2 }
   0xa   : > { %127 = sbr.rel (%p464_p6) target bundleno = 37 (0x25), region = 24 }
   0xf   : > { %130 = sbr.rel (!%p50_p4) target bundleno = 37 (0x25), region = 28  ;;  %s132_s21 = sand.u32 (%p50_p4), 1, %s536_s13  }
  0x10   : > { %s465_s22 = sshll.u32 (%p50_p4), %s540_s14, 3  ;;  %s490_s23 = smul.u32 (%p50_p4), 144, %s132_s21 }
  0x11   : > { %s603_s26 = scalar_lea.vmem (%p50_p4), %s708_s1, %s465_s22 }
  0x12   : > { %v199_v0 = vld [vmem:[%s603_s26] sm:$0xff] (%p50_p4)  ;;  %v201_v1 = vld [vmem:[%s603_s26 + $0x10] sm:$0xff] (%p50_p4)  ;;  %s608_s27 = scalar_lea.vmem (%p50_p4), [#allocation2], %s490_s23 }
  0x13   : > { %v203_v2 = vld [vmem:[%s603_s26 + $0x20] sm:$0xff] (%p50_p4)  ;;  %200 = vst [vmem:[%s608_s27] sm:$0xff] (%p50_p4), %v199_v0  ;;  %v205_v3 = vld [vmem:[%s603_s26 + $0x30] sm:$0xff] (%p50_p4) }
  0x14   : > { %202 = vst [vmem:[%s608_s27 + $0x8] sm:$0xff] %v201_v1  ;;  %v207_v4 = vld [vmem:[%s603_s26 + $0x40] sm:$0xff]  ;;  %v209_v5 = vld [vmem:[%s603_s26 + $0x50] sm:$0xff] }
  0x15   : > { %204 = vst [vmem:[%s608_s27 + $0x10] sm:$0xff] %v203_v2  ;;  %v211_v6 = vld [vmem:[%s603_s26 + $0x60] sm:$0xff]  ;;  %v213_v7 = vld [vmem:[%s603_s26 + $0x70] sm:$0xff] }
  0x16   : > { %206 = vst [vmem:[%s608_s27 + $0x18] sm:$0xff] %v205_v3  ;;  %v215_v8 = vld [vmem:[%s603_s26 + $0x80] sm:$0xff]  ;;  %v217_v9 = vld [vmem:[%s603_s26 + $0x90] sm:$0xff] }
  0x17   : > { %208 = vst [vmem:[%s608_s27 + $0x20] sm:$0xff] %v207_v4  ;;  %v219_v10 = vld [vmem:[%s603_s26 + $0xa0] sm:$0xff]  ;;  %v221_v11 = vld [vmem:[%s603_s26 + $0xb0] sm:$0xff] }
  0x18   : > { %210 = vst [vmem:[%s608_s27 + $0x28] sm:$0xff] %v209_v5  ;;  %v223_v12 = vld [vmem:[%s603_s26 + $0xc0] sm:$0xff]  ;;  %v225_v13 = vld [vmem:[%s603_s26 + $0xd0] sm:$0xff] }
  0x19   : > { %212 = vst [vmem:[%s608_s27 + $0x30] sm:$0xff] %v211_v6  ;;  %v227_v14 = vld [vmem:[%s603_s26 + $0xe0] sm:$0xff]  ;;  %v229_v15 = vld [vmem:[%s603_s26 + $0xf0] sm:$0xff] }
  0x1a   : > { %214 = vst [vmem:[%s608_s27 + $0x38] sm:$0xff] %v213_v7  ;;  %v231_v16 = vld [vmem:[%s603_s26 + $0x100] sm:$0xff]  ;;  %v233_v17 = vld [vmem:[%s603_s26 + $0x110] sm:$0xff] }
  0x1b   : > { %216 = vst [vmem:[%s608_s27 + $0x40] sm:$0xff] %v215_v8 }
  0x1c   : > { %218 = vst [vmem:[%s608_s27 + $0x48] sm:$0xff] %v217_v9 }
  0x1d   : > { %220 = vst [vmem:[%s608_s27 + $0x50] sm:$0xff] %v219_v10 }
  0x1e   : > { %222 = vst [vmem:[%s608_s27 + $0x58] sm:$0xff] %v221_v11 }
  0x1f   : > { %224 = vst [vmem:[%s608_s27 + $0x60] sm:$0xff] %v223_v12 }
  0x20   : > { %226 = vst [vmem:[%s608_s27 + $0x68] sm:$0xff] %v225_v13 }
  0x21   : > { %228 = vst [vmem:[%s608_s27 + $0x70] sm:$0xff] %v227_v14 }
  0x22   : > { %230 = vst [vmem:[%s608_s27 + $0x78] sm:$0xff] %v229_v15 }
  0x23   : > { %232 = vst [vmem:[%s608_s27 + $0x80] sm:$0xff] %v231_v16 }
  0x24   : > { %234 = vst [vmem:[%s608_s27 + $0x88] sm:$0xff] %v233_v17 }
  0x25 PF: > { %p466_p7 = scmp.ge.s32.totalorder %s540_s14, 1  ;;  %p239_p8 = scmp.lt.s32.totalorder %s540_s14, 3 }
  0x27   : > { %p240_p9 = pnand %p466_p7, %p239_p8 }
  0x28   : > { %s246_s28 = sand.u32 (!%p240_p9), 1, %s532_s12  }
  0x29   : > { %243 = sbr.rel (%p240_p9) target bundleno = 226 (0xe2), region = 66  ;;  %s467_s23 = sshll.u32 (!%p240_p9), %s246_s28, 4 }
  0x2a   : > { %s491_s29 = smul.u32 (!%p240_p9), 144, %s246_s28  ;;  %s267_s24 = scalar_lea.vmem (!%p240_p9), [#allocation3], %s467_s23 }
  0x2c   : > { %s648_s30 = scalar_lea.vmem (!%p240_p9), [#allocation2], %s491_s29 }
  0x2e   : > { %v287_v18 = vld [vmem:[%s648_s30 + $0x78] sm:$0xff]  ;;  %v286_v19 = vld [vmem:[%s648_s30 + $0x70] sm:$0xff]  ;;  %v542_v20 = vmov 0   ;;  %v285_v21 = vld [vmem:[%s648_s30 + $0x68] sm:$0xff]  ;;  %vm302_vm0 = vcmask 130048   ;;  %s471_s25 = sshll.u32 (%p593_p5), %s461_s15, 3 }
  0x2f   : > { %517 = vset.pattern.permute.xlu0 %v542_v20  ;;  %309 = vmatpush.msra.mxu0 %v287_v18  ;;  %v284_v22 = vld [vmem:[%s648_s30 + $0x60] sm:$0xff]  ;;  %v289_v23 = vld [vmem:[%s648_s30 + $0x88] sm:$0xff]  ;;  %v283_v25 = vld [vmem:[%s648_s30 + $0x58] sm:$0xff]  ;;  %s367_s27 = scalar_lea.vmem (%p593_p5), %s710_s3, %s471_s25 }
  0x30   : > { %474 = vmatpush.msra.mxu2 %v287_v18  ;;  %v288_v24 = vld [vmem:[%s648_s30 + $0x80] sm:$0xff]  ;;  %346 = vmatpush.msra.mxu1 %v289_v23  ;;  %v269_v27 = vld [vmem:[%s707_s0 + $0x8] sm:$0xff]  ;;  %v282_v28 = vld [vmem:[%s648_s30 + $0x50] sm:$0xff] }
  0x31   : > { %310 = vmatpush.msra.mxu0 %v286_v19  ;;  %v290_v26 = vld [vmem:[%s709_s2] sm:$0xff]  ;;  %v281_v29 = vld [vmem:[%s648_s30 + $0x48] sm:$0xff]  ;;  %v279_v32 = vld [vmem:[%s648_s30 + $0x38] sm:$0xff] }
  0x32   : > { %475 = vmatpush.msra.mxu2 %v286_v19  ;;  %347 = vmatpush.msra.mxu1 %v288_v24  ;;  %v280_v30 = vld [vmem:[%s648_s30 + $0x40] sm:$0xff]  ;;  %v291_v31 = vld [vmem:[%s709_s2 + $0x8] sm:$0xff]  ;;  %v271_v33 = vld [vmem:[%s707_s0 + $0x18] sm:$0xff] }
  0x33   : > { %311 = vmatpush.msra.mxu0 %v285_v21  ;;  %294 = vperm.xlu0 %517, %v290_v26   ;;  %v278_v34 = vld [vmem:[%s648_s30 + $0x30] sm:$0xff]  ;;  %v277_v35 = vld [vmem:[%s648_s30 + $0x28] sm:$0xff]  ;;  %v276_v36 = vld [vmem:[%s648_s30 + $0x20] sm:$0xff] }
  0x34   : > { %476 = vmatpush.msra.mxu2 %v285_v21  ;;  %468 = vmatmul.msk.f32.vlgmr.msra.gmra.mxu1 %vm302_vm0, %v269_v27  ;;  %v275_v37 = vld [vmem:[%s648_s30 + $0x18] sm:$0xff]  ;;  %v274_v38 = vld [vmem:[%s648_s30 + $0x10] sm:$0xff]  ;;  %v273_v39 = vld [vmem:[%s648_s30 + $0x8] sm:$0xff] }
  0x35   : > { %312 = vmatpush.msra.mxu0 %v284_v22  ;;  %v272_v40 = vld [vmem:[%s648_s30] sm:$0xff] }
  0x36   : > { %477 = vmatpush.msra.mxu2 %v284_v22  ;;  %v268_v41 = vld [vmem:[%s707_s0] sm:$0xff]  ;;  %v270_v42 = vld [vmem:[%s707_s0 + $0x10] sm:$0xff] }
  0x37   : > { %313 = vmatpush.msra.mxu0 %v283_v25 }
  0x38   : > { %478 = vmatpush.msra.mxu2 %v283_v25 }
  0x39   : > { %314 = vmatpush.msra.mxu0 %v282_v28 }
  0x3a   : > { %479 = vmatpush.msra.mxu2 %v282_v28 }
  0x3b   : > { %315 = vmatpush.msra.mxu0 %v281_v29  ;;  %299 = vperm.xlu0 %517, %v291_v31  }
  0x3c   : > { %480 = vmatpush.msra.mxu2 %v281_v29  ;;  %469 = vmatmul.msk.f32.gmra.mxu1 %vm302_vm0, %v271_v33 }
  0x3d   : > { %316 = vmatpush.msra.mxu0 %v280_v30 }
  0x3e   : > { %481 = vmatpush.msra.mxu2 %v280_v30 }
  0x3f   : > { %317 = vmatpush.msra.mxu0 %v279_v32 }
  0x40   : > { %482 = vmatpush.msra.mxu2 %v279_v32 }
  0x41   : > { %318 = vmatpush.msra.mxu0 %v278_v34 }
  0x42   : > { %483 = vmatpush.msra.mxu2 %v278_v34 }
  0x43   : > { %319 = vmatpush.msra.mxu0 %v277_v35 }
  0x44   : > { %484 = vmatpush.msra.mxu2 %v277_v35 }
  0x45   : > { %320 = vmatpush.msra.mxu0 %v276_v36 }
  0x46   : > { %485 = vmatpush.msra.mxu2 %v276_v36 }
  0x47   : > { %321 = vmatpush.msra.mxu0 %v275_v37 }
  0x48   : > { %486 = vmatpush.msra.mxu2 %v275_v37 }
  0x49   : > { %322 = vmatpush.msra.mxu0 %v274_v38 }
  0x4a   : > { %487 = vmatpush.msra.mxu2 %v274_v38 }
  0x4b   : > { %323 = vmatpush.msra.mxu0 %v273_v39 }
  0x4c   : > { %488 = vmatpush.msra.mxu2 %v273_v39 }
  0x4d   : > { %324 = vmatpush.msra.mxu0 %v272_v40 }
  0x4e   : > { %489 = vmatpush.msra.mxu2 %v272_v40  ;;  %325 = vmatmul.f32.vlgmr.msra.gmra.mxu0 %v268_v41 }
  0x4f   : > { %328 = vmatmul.f32.vlgmr.msra.gmra.mxu2 %v270_v42 }
  0xa5   : > { %v295_v43 = vpop.permute.xlu0 %294 }
  0xad   : > { %v300_v48 = vpop.permute.xlu0 %299 }
  0xb1   : > { %v349_v44 = vpop.f32.mrf.mxu1 }
  0xb9   : > { %v352_v51 = vpop.f32.mrf.mxu1 }
  0xcb   : > { %v326_v45 = vpop.f32.mrf.mxu0 }
  0xcc   : > { %v327_v46 = vadd.f32 %v326_v45, %v295_v43 }
  0xce   : > { %v350_v47 = vadd.f32 %v349_v44, %v327_v46 }
  0xd0   : > { %v355_v49 = vmax.f32 %v350_v47, 0.0 }
  0xd2   : > { %v329_v50 = vpop.f32.mrf.mxu2  ;;  %357 = vst [vmem:[%s267_s24] sm:$0xff] %v355_v49 }
  0xd3   : > { %v330_v52 = vadd.f32 %v329_v50, %v300_v48 }
  0xd5   : > { %v353_v53 = vadd.f32 %v352_v51, %v330_v52  ;;  %365 = sbr.rel (!%p593_p5) target bundleno = 226 (0xe2), region = 74 }
  0xd7   : > { %v356_v54 = vmax.f32 %v353_v53, 0.0 }
  0xd9   : > { %358 = vst [vmem:[%s267_s24 + $0x8] sm:$0xff] %v356_v54  ;;  %v398_v55 = vld [vmem:[%s267_s24] sm:$0xff] (%p593_p5) }
  0xda   : > { %399 = vst [vmem:[%s367_s27] sm:$0xff] %v398_v55 }
  0xe0   : > { %v400_v56 = vld [vmem:[%s267_s24 + $0x8] sm:$0xff] }
  0xe1   : > { %401 = vst [vmem:[%s367_s27 + $0x10] sm:$0xff] %v400_v56 }
  0xe2 PF: > { %p10_p10 = scmp.ge.s32.totalorder %s580_s16, 4   ;;  %s712_s12 = smov %s536_s13 }
  0xe3   : > { %s713_s13 = smov %s591_s19  ;;  %s714_s14 = smov %s580_s16 }
  0xe4   :  { %12 = sbr.rel (!%p10_p10) target bundleno = 2 (0x2), region = 143 }

// kernel: features_extractor.13
= control target key start
LH: loop header
LB: loop body
LE: loop exit
PB: predicated region body
PF: predicated region fallthrough
CT: control target
= control target key end

     0   :  { %s679_s15 = smov 0   ;;  %s681_s16 = smov 0   ;;  %s836_s0 = inlined_call_operand.vmem [shape: f32[16,144], index: 0, kind: input, shape index: {}]   ;;  %s837_s1 = inlined_call_operand.vmem [shape: f32[144,256], index: 1, kind: input, shape index: {}]   ;;  %s838_s2 = inlined_call_operand.vmem [shape: f32[16,1], index: 2, kind: input, shape index: {}]   ;;  %s839_s3 = inlined_call_operand.vmem [shape: f32[16,256], index: 3, kind: input, shape index: {}]   ;;  %s840_s4 = inlined_call_operand.vmem [shape: f32[16,256], index: 4, kind: output, shape index: {}]  }
   0x1   :  { %s683_s17 = smov 0  }
   0x2 LB: > { %s569_s18 = sadd.s32 4294967295, %s651_s17   ;;  %s696_s19 = sadd.s32 1, %s651_s17   ;;  %s651_s17 = sphi %s683_s17, %s845_s17   ;;  %s647_s16 = sphi %s681_s16, %s844_s16   ;;  %s643_s15 = sphi %s679_s15, %s843_s15  }
   0x3   : > { %s39_s20 = ssub.s32 %s651_s17, %s696_s19  ;;  %s42_s21 = sadd.s32 1, %s647_s16 }
   0x4   : > { %p40_p0 = scmp.eq.s32.totalorder %s39_s20, 0  ;;  %p49_p1 = scmp.ne.s32.totalorder %s647_s16, %s643_s15 }
   0x5   : > { %p50_p2 = scmp.eq.s32.totalorder %s651_s17, 0  ;;  %p126_p3 = scmp.eq.s32.totalorder %s569_s18, 1 }
   0x6   : > { %s707_s22 = scalar_select %p40_p0, %s647_s16, %s42_s21  }
   0x7   : > { %p709_p4 = por %p50_p2, %p49_p1  ;;  %p713_p5 = por %p126_p3, %p49_p1 }
   0x8   : > { %p572_p6 = scmp.ge.s32.totalorder %s651_s17, 2 }
   0xa   : > { %154 = sbr.rel (%p572_p6) target bundleno = 43 (0x2b), region = 24 }
   0xf   : > { %157 = sbr.rel (!%p709_p4) target bundleno = 37 (0x25), region = 28  ;;  %s159_s25 = sand.u32 (%p709_p4), 1, %s647_s16  }
  0x10   : > { %s573_s26 = sshll.u32 (%p709_p4), %s651_s17, 3  ;;  %s601_s27 = smul.u32 (%p709_p4), 144, %s159_s25 }
  0x11   : > { %s725_s30 = scalar_lea.vmem (%p709_p4), %s837_s1, %s573_s26 }
  0x12   : > { %v226_v0 = vld [vmem:[%s725_s30] sm:$0xff] (%p709_p4)  ;;  %v228_v1 = vld [vmem:[%s725_s30 + $0x10] sm:$0xff] (%p709_p4)  ;;  %s730_s5 = scalar_lea.vmem (%p709_p4), [#allocation2], %s601_s27 }
  0x13   : > { %v230_v2 = vld [vmem:[%s725_s30 + $0x20] sm:$0xff] (%p709_p4)  ;;  %227 = vst [vmem:[%s730_s5] sm:$0xff] (%p709_p4), %v226_v0  ;;  %v232_v3 = vld [vmem:[%s725_s30 + $0x30] sm:$0xff] (%p709_p4) }
  0x14   : > { %229 = vst [vmem:[%s730_s5 + $0x8] sm:$0xff] %v228_v1  ;;  %v234_v4 = vld [vmem:[%s725_s30 + $0x40] sm:$0xff]  ;;  %v236_v5 = vld [vmem:[%s725_s30 + $0x50] sm:$0xff] }
  0x15   : > { %231 = vst [vmem:[%s730_s5 + $0x10] sm:$0xff] %v230_v2  ;;  %v238_v6 = vld [vmem:[%s725_s30 + $0x60] sm:$0xff]  ;;  %v240_v7 = vld [vmem:[%s725_s30 + $0x70] sm:$0xff] }
  0x16   : > { %233 = vst [vmem:[%s730_s5 + $0x18] sm:$0xff] %v232_v3  ;;  %v242_v8 = vld [vmem:[%s725_s30 + $0x80] sm:$0xff]  ;;  %v244_v9 = vld [vmem:[%s725_s30 + $0x90] sm:$0xff] }
  0x17   : > { %235 = vst [vmem:[%s730_s5 + $0x20] sm:$0xff] %v234_v4  ;;  %v246_v10 = vld [vmem:[%s725_s30 + $0xa0] sm:$0xff]  ;;  %v248_v11 = vld [vmem:[%s725_s30 + $0xb0] sm:$0xff] }
  0x18   : > { %237 = vst [vmem:[%s730_s5 + $0x28] sm:$0xff] %v236_v5  ;;  %v250_v12 = vld [vmem:[%s725_s30 + $0xc0] sm:$0xff]  ;;  %v252_v13 = vld [vmem:[%s725_s30 + $0xd0] sm:$0xff] }
  0x19   : > { %239 = vst [vmem:[%s730_s5 + $0x30] sm:$0xff] %v238_v6  ;;  %v254_v14 = vld [vmem:[%s725_s30 + $0xe0] sm:$0xff]  ;;  %v256_v15 = vld [vmem:[%s725_s30 + $0xf0] sm:$0xff] }
  0x1a   : > { %241 = vst [vmem:[%s730_s5 + $0x38] sm:$0xff] %v240_v7  ;;  %v258_v16 = vld [vmem:[%s725_s30 + $0x100] sm:$0xff]  ;;  %v260_v17 = vld [vmem:[%s725_s30 + $0x110] sm:$0xff] }
  0x1b   : > { %243 = vst [vmem:[%s730_s5 + $0x40] sm:$0xff] %v242_v8 }
  0x1c   : > { %245 = vst [vmem:[%s730_s5 + $0x48] sm:$0xff] %v244_v9 }
  0x1d   : > { %247 = vst [vmem:[%s730_s5 + $0x50] sm:$0xff] %v246_v10 }
  0x1e   : > { %249 = vst [vmem:[%s730_s5 + $0x58] sm:$0xff] %v248_v11 }
  0x1f   : > { %251 = vst [vmem:[%s730_s5 + $0x60] sm:$0xff] %v250_v12 }
  0x20   : > { %253 = vst [vmem:[%s730_s5 + $0x68] sm:$0xff] %v252_v13 }
  0x21   : > { %255 = vst [vmem:[%s730_s5 + $0x70] sm:$0xff] %v254_v14 }
  0x22   : > { %257 = vst [vmem:[%s730_s5 + $0x78] sm:$0xff] %v256_v15 }
  0x23   : > { %259 = vst [vmem:[%s730_s5 + $0x80] sm:$0xff] %v258_v16 }
  0x24   : > { %261 = vst [vmem:[%s730_s5 + $0x88] sm:$0xff] %v260_v17 }
  0x25 PF: > { %267 = sbr.rel (!%p709_p4) target bundleno = 43 (0x2b), region = 66  ;;  %s269_s6 = sand.u32 (%p709_p4), 1, %s647_s16  }
  0x26   : > { %s575_s7 = sshll.u32 (%p709_p4), %s651_s17, 3  ;;  %s574_s8 = sshll.u32 (%p709_p4), %s269_s6, 4 }
  0x27   : > { %s273_s11 = scalar_lea.vmem (%p709_p4), %s839_s3, %s575_s7  ;;  %s271_s12 = scalar_lea.vmem (%p709_p4), [#allocation3], %s574_s8 }
  0x28   : > { %v304_v18 = vld [vmem:[%s273_s11] sm:$0xff] (%p709_p4)  ;;  %v306_v19 = vld [vmem:[%s273_s11 + $0x10] sm:$0xff] (%p709_p4) }
  0x29   : > { %305 = vst [vmem:[%s271_s12] sm:$0xff] (%p709_p4), %v304_v18 }
  0x2a   : > { %307 = vst [vmem:[%s271_s12 + $0x8] sm:$0xff] %v306_v19 }
  0x2b PF: > { %p576_p7 = scmp.ge.s32.totalorder %s651_s17, 1  ;;  %p312_p8 = scmp.lt.s32.totalorder %s651_s17, 3 }
  0x2d   : > { %p313_p9 = pnand %p576_p7, %p312_p8 }
  0x2e   : > { %s319_s13 = sand.u32 (!%p313_p9), 1, %s643_s15  }
  0x2f   : > { %316 = sbr.rel (%p313_p9) target bundleno = 234 (0xea), region = 104  ;;  %s577_s9 = sshll.u32 (!%p313_p9), %s319_s13, 4 }
  0x30   : > { %s602_s14 = smul.u32 (!%p313_p9), 144, %s319_s13  ;;  %s328_s10 = scalar_lea.vmem (!%p313_p9), [#allocation3], %s577_s9 }
  0x31   : > { %s353_s11 = scalar_lea.vmem (!%p313_p9), [#allocation4], %s577_s9 }
  0x32   : > { %s777_s20 = scalar_lea.vmem (!%p313_p9), [#allocation2], %s602_s14 }
  0x34   : > { %v373_v20 = vld [vmem:[%s777_s20 + $0x78] sm:$0xff]  ;;  %v372_v21 = vld [vmem:[%s777_s20 + $0x70] sm:$0xff]  ;;  %v653_v22 = vmov 0   ;;  %v371_v23 = vld [vmem:[%s777_s20 + $0x68] sm:$0xff]  ;;  %vm388_vm0 = vcmask 130048   ;;  %s582_s15 = sshll.u32 (%p713_p5), %s569_s18, 3 }
  0x35   : > { %628 = vset.pattern.permute.xlu0 %v653_v22  ;;  %395 = vmatpush.msra.mxu0 %v373_v20  ;;  %v370_v24 = vld [vmem:[%s777_s20 + $0x60] sm:$0xff]  ;;  %v375_v25 = vld [vmem:[%s777_s20 + $0x88] sm:$0xff]  ;;  %v369_v27 = vld [vmem:[%s777_s20 + $0x58] sm:$0xff]  ;;  %s457_s14 = scalar_lea.vmem (%p713_p5), %s840_s4, %s582_s15 }
  0x36   : > { %585 = vmatpush.msra.mxu2 %v373_v20  ;;  %v374_v26 = vld [vmem:[%s777_s20 + $0x80] sm:$0xff]  ;;  %432 = vmatpush.msra.mxu1 %v375_v25  ;;  %v355_v29 = vld [vmem:[%s836_s0 + $0x8] sm:$0xff]  ;;  %v368_v30 = vld [vmem:[%s777_s20 + $0x50] sm:$0xff] }
  0x37   : > { %396 = vmatpush.msra.mxu0 %v372_v21  ;;  %v376_v28 = vld [vmem:[%s838_s2] sm:$0xff]  ;;  %v367_v31 = vld [vmem:[%s777_s20 + $0x48] sm:$0xff]  ;;  %v365_v34 = vld [vmem:[%s777_s20 + $0x38] sm:$0xff] }
  0x38   : > { %586 = vmatpush.msra.mxu2 %v372_v21  ;;  %433 = vmatpush.msra.mxu1 %v374_v26  ;;  %v366_v32 = vld [vmem:[%s777_s20 + $0x40] sm:$0xff]  ;;  %v377_v33 = vld [vmem:[%s838_s2 + $0x8] sm:$0xff]  ;;  %v357_v35 = vld [vmem:[%s836_s0 + $0x18] sm:$0xff] }
  0x39   : > { %397 = vmatpush.msra.mxu0 %v371_v23  ;;  %380 = vperm.xlu0 %628, %v376_v28   ;;  %v364_v36 = vld [vmem:[%s777_s20 + $0x30] sm:$0xff]  ;;  %v363_v37 = vld [vmem:[%s777_s20 + $0x28] sm:$0xff]  ;;  %v362_v38 = vld [vmem:[%s777_s20 + $0x20] sm:$0xff] }
  0x3a   : > { %587 = vmatpush.msra.mxu2 %v371_v23  ;;  %579 = vmatmul.msk.f32.vlgmr.msra.gmra.mxu1 %vm388_vm0, %v355_v29  ;;  %v361_v39 = vld [vmem:[%s777_s20 + $0x18] sm:$0xff]  ;;  %v360_v40 = vld [vmem:[%s777_s20 + $0x10] sm:$0xff]  ;;  %v359_v41 = vld [vmem:[%s777_s20 + $0x8] sm:$0xff] }
  0x3b   : > { %398 = vmatpush.msra.mxu0 %v370_v24  ;;  %v358_v42 = vld [vmem:[%s777_s20] sm:$0xff]  ;;  %v442_v57 = vld [vmem:[%s328_s10 + $0x8] sm:$0xff] }
  0x3c   : > { %588 = vmatpush.msra.mxu2 %v370_v24  ;;  %v354_v43 = vld [vmem:[%s836_s0] sm:$0xff]  ;;  %v356_v44 = vld [vmem:[%s836_s0 + $0x10] sm:$0xff] }
  0x3d   : > { %399 = vmatpush.msra.mxu0 %v369_v27  ;;  %v441_v49 = vld [vmem:[%s328_s10] sm:$0xff] }
  0x3e   : > { %589 = vmatpush.msra.mxu2 %v369_v27 }
  0x3f   : > { %400 = vmatpush.msra.mxu0 %v368_v30 }
  0x40   : > { %590 = vmatpush.msra.mxu2 %v368_v30 }
  0x41   : > { %401 = vmatpush.msra.mxu0 %v367_v31  ;;  %385 = vperm.xlu0 %628, %v377_v33  }
  0x42   : > { %591 = vmatpush.msra.mxu2 %v367_v31  ;;  %580 = vmatmul.msk.f32.gmra.mxu1 %vm388_vm0, %v357_v35 }
  0x43   : > { %402 = vmatpush.msra.mxu0 %v366_v32 }
  0x44   : > { %592 = vmatpush.msra.mxu2 %v366_v32 }
  0x45   : > { %403 = vmatpush.msra.mxu0 %v365_v34 }
  0x46   : > { %593 = vmatpush.msra.mxu2 %v365_v34 }
  0x47   : > { %404 = vmatpush.msra.mxu0 %v364_v36 }
  0x48   : > { %594 = vmatpush.msra.mxu2 %v364_v36 }
  0x49   : > { %405 = vmatpush.msra.mxu0 %v363_v37 }
  0x4a   : > { %595 = vmatpush.msra.mxu2 %v363_v37 }
  0x4b   : > { %406 = vmatpush.msra.mxu0 %v362_v38 }
  0x4c   : > { %596 = vmatpush.msra.mxu2 %v362_v38 }
  0x4d   : > { %407 = vmatpush.msra.mxu0 %v361_v39 }
  0x4e   : > { %597 = vmatpush.msra.mxu2 %v361_v39 }
  0x4f   : > { %408 = vmatpush.msra.mxu0 %v360_v40 }
  0x50   : > { %598 = vmatpush.msra.mxu2 %v360_v40 }
  0x51   : > { %409 = vmatpush.msra.mxu0 %v359_v41 }
  0x52   : > { %599 = vmatpush.msra.mxu2 %v359_v41 }
  0x53   : > { %410 = vmatpush.msra.mxu0 %v358_v42 }
  0x54   : > { %600 = vmatpush.msra.mxu2 %v358_v42  ;;  %411 = vmatmul.f32.vlgmr.msra.gmra.mxu0 %v354_v43 }
  0x55   : > { %414 = vmatmul.f32.vlgmr.msra.gmra.mxu2 %v356_v44 }
  0xab   : > { %v381_v45 = vpop.permute.xlu0 %380 }
  0xb3   : > { %v386_v51 = vpop.permute.xlu0 %385 }
  0xb7   : > { %v435_v46 = vpop.f32.mrf.mxu1 }
  0xbf   : > { %v438_v54 = vpop.f32.mrf.mxu1 }
  0xd1   : > { %v412_v47 = vpop.f32.mrf.mxu0 }
  0xd2   : > { %v413_v48 = vadd.f32 %v412_v47, %v381_v45 }
  0xd4   : > { %v436_v50 = vadd.f32 %v435_v46, %v413_v48 }
  0xd6   : > { %v443_v52 = vadd.f32 %v441_v49, %v436_v50 }
  0xd8   : > { %v415_v53 = vpop.f32.mrf.mxu2  ;;  %v445_v55 = vmax.f32 %v443_v52, 0.0 }
  0xd9   : > { %v416_v56 = vadd.f32 %v415_v53, %v386_v51 }
  0xda   : > { %447 = vst [vmem:[%s353_s11] sm:$0xff] %v445_v55 }
  0xdb   : > { %v439_v58 = vadd.f32 %v438_v54, %v416_v56 }
  0xdd   : > { %v444_v59 = vadd.f32 %v442_v57, %v439_v58  ;;  %455 = sbr.rel (!%p713_p5) target bundleno = 234 (0xea), region = 116 }
  0xdf   : > { %v446_v60 = vmax.f32 %v444_v59, 0.0 }
  0xe1   : > { %448 = vst [vmem:[%s353_s11 + $0x8] sm:$0xff] %v446_v60  ;;  %v488_v61 = vld [vmem:[%s353_s11] sm:$0xff] (%p713_p5) }
  0xe2   : > { %489 = vst [vmem:[%s457_s14] sm:$0xff] %v488_v61 }
  0xe8   : > { %v490_v62 = vld [vmem:[%s353_s11 + $0x8] sm:$0xff] }
  0xe9   : > { %491 = vst [vmem:[%s457_s14 + $0x10] sm:$0xff] %v490_v62 }
  0xea PF: > { %p11_p10 = scmp.ge.s32.totalorder %s696_s19, 4   ;;  %s843_s15 = smov %s647_s16 }
  0xeb   : > { %s844_s16 = smov %s707_s22  ;;  %s845_s17 = smov %s696_s19 }
  0xec   :  { %13 = sbr.rel (!%p11_p10) target bundleno = 2 (0x2), region = 193 }

// kernel: features_extractor.14
= control target key start
LH: loop header
LB: loop body
LE: loop exit
PB: predicated region body
PF: predicated region fallthrough
CT: control target
= control target key end

     0   :  { %v128_v2 = vmov 0   ;;  %vm48_vm0 = vcmask 130048   ;;  %vm101_vm1 = vcmask 343040   ;;  %s229_s1 = inlined_call_operand.vmem [shape: f32[144,42], index: 1, kind: input, shape index: {}]   ;;  %s230_s0 = inlined_call_operand.vmem [shape: f32[16,144], index: 0, kind: input, shape index: {}]   ;;  %s231_s2 = inlined_call_operand.vmem [shape: f32[16,1], index: 2, kind: input, shape index: {}]   ;;  %s232_s3 = inlined_call_operand.vmem [shape: f32[16,42], index: 3, kind: output, shape index: {}]  }
   0x1   :  { %v33_v0 = vld [vmem:[%s229_s1 + $0x78] sm:$0xff]  ;;  %v32_v1 = vld [vmem:[%s229_s1 + $0x70] sm:$0xff]  ;;  %127 = vset.pattern.permute.xlu0 %v128_v2  ;;  %v31_v3 = vld [vmem:[%s229_s1 + $0x68] sm:$0xff] }
   0x2   :  { %55 = vmatpush.msra.mxu0 %v33_v0  ;;  %110 = vmatpush.msra.mxu2 %v33_v0  ;;  %v30_v4 = vld [vmem:[%s229_s1 + $0x60] sm:$0xff]  ;;  %v35_v5 = vld [vmem:[%s229_s1 + $0x88] sm:$0xff]  ;;  %v29_v7 = vld [vmem:[%s229_s1 + $0x58] sm:$0xff] }
   0x3   :  { %v34_v6 = vld [vmem:[%s229_s1 + $0x80] sm:$0xff]  ;;  %92 = vmatpush.msra.mxu1 %v35_v5  ;;  %v15_v8 = vld [vmem:[%s230_s0 + $0x8] sm:$0xff]  ;;  %v28_v10 = vld [vmem:[%s229_s1 + $0x50] sm:$0xff] }
   0x4   :  { %56 = vmatpush.msra.mxu0 %v32_v1  ;;  %111 = vmatpush.msra.mxu2 %v32_v1  ;;  %v36_v9 = vld [vmem:[%s231_s2] sm:$0xff]  ;;  %v27_v11 = vld [vmem:[%s229_s1 + $0x48] sm:$0xff]  ;;  %v25_v14 = vld [vmem:[%s229_s1 + $0x38] sm:$0xff] }
   0x5   :  { %93 = vmatpush.msra.mxu1 %v34_v6  ;;  %40 = vperm.xlu0 %127, %v36_v9   ;;  %v26_v12 = vld [vmem:[%s229_s1 + $0x40] sm:$0xff]  ;;  %v37_v13 = vld [vmem:[%s231_s2 + $0x8] sm:$0xff]  ;;  %v17_v15 = vld [vmem:[%s230_s0 + $0x18] sm:$0xff] }
   0x6   :  { %57 = vmatpush.msra.mxu0 %v31_v3  ;;  %112 = vmatpush.msra.mxu2 %v31_v3  ;;  %v24_v16 = vld [vmem:[%s229_s1 + $0x30] sm:$0xff]  ;;  %v23_v17 = vld [vmem:[%s229_s1 + $0x28] sm:$0xff]  ;;  %v22_v18 = vld [vmem:[%s229_s1 + $0x20] sm:$0xff] }
   0x7   :  { %108 = vmatmul.msk.f32.vlgmr.msra.gmra.mxu1 %vm48_vm0, %v15_v8  ;;  %v21_v19 = vld [vmem:[%s229_s1 + $0x18] sm:$0xff]  ;;  %v20_v20 = vld [vmem:[%s229_s1 + $0x10] sm:$0xff]  ;;  %v19_v21 = vld [vmem:[%s229_s1 + $0x8] sm:$0xff] }
   0x8   :  { %58 = vmatpush.msra.mxu0 %v30_v4  ;;  %113 = vmatpush.msra.mxu2 %v30_v4  ;;  %v18_v22 = vld [vmem:[%s229_s1] sm:$0xff]  ;;  %v16_v24 = vld [vmem:[%s230_s0 + $0x10] sm:$0xff] }
   0x9   :  { %v14_v23 = vld [vmem:[%s230_s0] sm:$0xff] }
   0xa   :  { %59 = vmatpush.msra.mxu0 %v29_v7  ;;  %114 = vmatpush.msra.mxu2 %v29_v7 }
   0xc   :  { %60 = vmatpush.msra.mxu0 %v28_v10  ;;  %115 = vmatpush.msra.mxu2 %v28_v10 }
   0xd   :  { %45 = vperm.xlu0 %127, %v37_v13  }
   0xe   :  { %61 = vmatpush.msra.mxu0 %v27_v11  ;;  %116 = vmatpush.msra.mxu2 %v27_v11 }
   0xf   :  { %109 = vmatmul.msk.f32.gmra.mxu1 %vm48_vm0, %v17_v15 }
  0x10   :  { %62 = vmatpush.msra.mxu0 %v26_v12  ;;  %117 = vmatpush.msra.mxu2 %v26_v12 }
  0x12   :  { %63 = vmatpush.msra.mxu0 %v25_v14  ;;  %118 = vmatpush.msra.mxu2 %v25_v14 }
  0x14   :  { %64 = vmatpush.msra.mxu0 %v24_v16  ;;  %119 = vmatpush.msra.mxu2 %v24_v16 }
  0x16   :  { %65 = vmatpush.msra.mxu0 %v23_v17  ;;  %120 = vmatpush.msra.mxu2 %v23_v17 }
  0x18   :  { %66 = vmatpush.msra.mxu0 %v22_v18  ;;  %121 = vmatpush.msra.mxu2 %v22_v18 }
  0x1a   :  { %67 = vmatpush.msra.mxu0 %v21_v19  ;;  %122 = vmatpush.msra.mxu2 %v21_v19 }
  0x1c   :  { %68 = vmatpush.msra.mxu0 %v20_v20  ;;  %123 = vmatpush.msra.mxu2 %v20_v20 }
  0x1e   :  { %69 = vmatpush.msra.mxu0 %v19_v21  ;;  %124 = vmatpush.msra.mxu2 %v19_v21 }
  0x20   :  { %70 = vmatpush.msra.mxu0 %v18_v22  ;;  %125 = vmatpush.msra.mxu2 %v18_v22 }
  0x21   :  { %71 = vmatmul.f32.vlgmr.msra.gmra.mxu0 %v14_v23  ;;  %74 = vmatmul.f32.vlgmr.msra.gmra.mxu2 %v16_v24 }
  0x77   :  { %v41_v25 = vpop.permute.xlu0 %40 }
  0x7f   :  { %v46_v30 = vpop.permute.xlu0 %45 }
  0x84   :  { %v95_v26 = vpop.f32.mrf.mxu1 }
  0x8c   :  { %v98_v32 = vpop.f32.mrf.mxu1 }
  0x9e   :  { %v72_v27 = vpop.f32.mrf.mxu0 }
  0x9f   :  { %v73_v28 = vadd.f32 %v72_v27, %v41_v25 }
  0xa1   :  { %v96_v29 = vadd.f32 %v95_v26, %v73_v28 }
  0xa3   :  { %102 = vst.msk [vmem:[%s232_s3] sm:$0xff] %vm101_vm1, %v96_v29 }
  0xa4   :  { %v75_v31 = vpop.f32.mrf.mxu2 }
  0xa5   :  { %v76_v33 = vadd.f32 %v75_v31, %v46_v30 }
  0xa7   :  { %v99_v34 = vadd.f32 %v98_v32, %v76_v33 }
  0xa9   :  { %103 = vst.msk [vmem:[%s232_s3 + $0x8] sm:$0xff] %vm101_vm1, %v99_v34 }

// kernel: features_extractor.15
= control target key start
LH: loop header
LB: loop body
LE: loop exit
PB: predicated region body
PF: predicated region fallthrough
CT: control target
= control target key end

     0   :  { %v93_v2 = vmov 0   ;;  %vm40_vm0 = vcmask 130048   ;;  %vm84_vm1 = vcmask 80896   ;;  %s180_s1 = inlined_call_operand.vmem [shape: f32[144,10], index: 1, kind: input, shape index: {}]   ;;  %s181_s2 = inlined_call_operand.vmem [shape: f32[8,1], index: 2, kind: input, shape index: {}]   ;;  %s182_s0 = inlined_call_operand.vmem [shape: f32[8,144], index: 0, kind: input, shape index: {}]   ;;  %s183_s3 = inlined_call_operand.vmem [shape: f32[8,10], index: 3, kind: output, shape index: {}]  }
   0x1   :  { %v31_v0 = vld [vmem:[%s180_s1 + $0x78] sm:$0xff]  ;;  %v30_v1 = vld [vmem:[%s180_s1 + $0x70] sm:$0xff]  ;;  %92 = vset.pattern.permute.xlu0 %v93_v2  ;;  %v29_v3 = vld [vmem:[%s180_s1 + $0x68] sm:$0xff] }
   0x2   :  { %44 = vmatpush.msra.mxu0 %v31_v0  ;;  %v28_v4 = vld [vmem:[%s180_s1 + $0x60] sm:$0xff]  ;;  %v27_v5 = vld [vmem:[%s180_s1 + $0x58] sm:$0xff]  ;;  %v33_v6 = vld [vmem:[%s180_s1 + $0x88] sm:$0xff] }
   0x3   :  { %78 = vmatpush.msra.mxu1 %v33_v6  ;;  %v32_v7 = vld [vmem:[%s180_s1 + $0x80] sm:$0xff]  ;;  %v15_v8 = vld [vmem:[%s182_s0 + $0x8] sm:$0xff]  ;;  %v26_v10 = vld [vmem:[%s180_s1 + $0x50] sm:$0xff] }
   0x4   :  { %45 = vmatpush.msra.mxu0 %v30_v1  ;;  %v34_v9 = vld [vmem:[%s181_s2] sm:$0xff]  ;;  %v25_v11 = vld [vmem:[%s180_s1 + $0x48] sm:$0xff]  ;;  %v23_v13 = vld [vmem:[%s180_s1 + $0x38] sm:$0xff] }
   0x5   :  { %37 = vperm.xlu0 %92, %v34_v9   ;;  %79 = vmatpush.msra.mxu1 %v32_v7  ;;  %v24_v12 = vld [vmem:[%s180_s1 + $0x40] sm:$0xff]  ;;  %v22_v14 = vld [vmem:[%s180_s1 + $0x30] sm:$0xff]  ;;  %v21_v15 = vld [vmem:[%s180_s1 + $0x28] sm:$0xff] }
   0x6   :  { %46 = vmatpush.msra.mxu0 %v29_v3  ;;  %90 = vmatmul.msk.f32.vlgmr.msra.gmra.mxu1 %vm40_vm0, %v15_v8  ;;  %v20_v16 = vld [vmem:[%s180_s1 + $0x20] sm:$0xff]  ;;  %v19_v17 = vld [vmem:[%s180_s1 + $0x18] sm:$0xff]  ;;  %v18_v18 = vld [vmem:[%s180_s1 + $0x10] sm:$0xff] }
   0x7   :  { %v17_v19 = vld [vmem:[%s180_s1 + $0x8] sm:$0xff]  ;;  %v16_v20 = vld [vmem:[%s180_s1] sm:$0xff] }
   0x8   :  { %47 = vmatpush.msra.mxu0 %v28_v4  ;;  %v14_v21 = vld [vmem:[%s182_s0] sm:$0xff] }
   0xa   :  { %48 = vmatpush.msra.mxu0 %v27_v5 }
   0xc   :  { %49 = vmatpush.msra.mxu0 %v26_v10 }
   0xe   :  { %50 = vmatpush.msra.mxu0 %v25_v11 }
  0x10   :  { %51 = vmatpush.msra.mxu0 %v24_v12 }
  0x12   :  { %52 = vmatpush.msra.mxu0 %v23_v13 }
  0x14   :  { %53 = vmatpush.msra.mxu0 %v22_v14 }
  0x16   :  { %54 = vmatpush.msra.mxu0 %v21_v15 }
  0x18   :  { %55 = vmatpush.msra.mxu0 %v20_v16 }
  0x1a   :  { %56 = vmatpush.msra.mxu0 %v19_v17 }
  0x1c   :  { %57 = vmatpush.msra.mxu0 %v18_v18 }
  0x1e   :  { %58 = vmatpush.msra.mxu0 %v17_v19 }
  0x20   :  { %59 = vmatpush.msra.mxu0 %v16_v20 }
  0x21   :  { %60 = vmatmul.f32.vlgmr.msra.gmra.mxu0 %v14_v21 }
  0x77   :  { %v38_v22 = vpop.permute.xlu0 %37 }
  0x83   :  { %v81_v24 = vpop.f32.mrf.mxu1 }
  0x9e   :  { %v61_v23 = vpop.f32.mrf.mxu0 }
  0x9f   :  { %v62_v25 = vadd.f32 %v61_v23, %v38_v22 }
  0xa1   :  { %v82_v26 = vadd.f32 %v81_v24, %v62_v25 }
  0xa3   :  { %85 = vst.msk [vmem:[%s183_s3] sm:$0xff] %vm84_vm1, %v82_v26 }

</bundles_post_ra>
